<compile_context>
chip_gen: v6e
topology: v6e:2x2x1
jax: 0.10.0
libtpu: 0.0.40
codegen_flags: <defaults>
</compile_context>

<pallas_src>
import numpy as np
import jax
import jax.numpy as jnp
from jax.experimental import pallas as pl
from jax.experimental.pallas import tpu as pltpu

B = 128          # batch (hard-coded by `s.view(128, 30)` in the PyTorch module)
C_IN = 128       # input channels (hard-coded by downsample Conv1d(in_channels=128))
C_MID = 30       # channels produced by the F / downsample branches
C_PAD = 32       # sublane-aligned padding of C_MID
L = 16           # input_sample_length (small, configurable)
B_TILE = 64      # batches per grid step -> grid=(2,): one step per v7x TensorCore
                 # (sweep 32/64/128 on single-TC v5e/v6e if this op ever matters there)
BN_EPS = 1e-5


def afr_kernel(x_ref, wct_ref, w2t_ref, vec_ref, pool_ref, exp_ref, out_ref):
    # x_ref:    (C_IN, B_TILE*L)   channels-major input slab (column j = (batch, length))
    # wct_ref:  (2*C_PAD, C_IN)    rows 0:30 = (w1*bn1_scale)^T, rows 32:62 = (wd*bnd_scale)^T
    # w2t_ref:  (C_PAD, C_PAD)     rows/cols 0:30 = (w2*bn2_scale)^T, rest zero
    # vec_ref:  (C_PAD, 8)         cols: 0=bn1_shift 1=bn2_shift 2=bnd_shift 3=ew2 4=ew1
    # pool_ref: (B_TILE*L, B_TILE) precomputed length-mean matrix (1/L where same batch)
    # exp_ref:  (B_TILE, B_TILE*L) precomputed gate-broadcast matrix (1 where same batch)
    # out_ref:  (C_PAD, B_TILE*L)  padded (32-row) output slab, rows 30:32 are zero
    x = x_ref[...]                                     # (128, 1024)
    b1 = vec_ref[:, 0:1]                               # (32, 1) column vectors
    b2 = vec_ref[:, 1:2]
    bd = vec_ref[:, 2:3]
    ew2c = vec_ref[:, 3:4]
    ew1c = vec_ref[:, 4:5]

    # Fused 1x1 convs over channels (F-branch conv1 + downsample conv share the RHS).
    g = jnp.dot(wct_ref[...], x, preferred_element_type=jnp.float32)        # (64, 1024)
    h = jnp.maximum(g[0:C_PAD, :] + b1, 0.0)                                 # BN1 shift + ReLU
    d = g[C_PAD:2 * C_PAD, :] + bd                                           # downsample + BN3
    f = jnp.dot(w2t_ref[...], h, preferred_element_type=jnp.float32) + b2    # conv2 + BN2

    # Squeeze: mean over length via the precomputed 0/1 pooling matmul (MXU, no VPU masks).
    s_t = jnp.dot(f, pool_ref[...], preferred_element_type=jnp.float32)      # (32, 64)

    # Excite: Linear(30->1, no bias) -> ReLU -> Linear(1->30, no bias) -> Sigmoid.
    hr = jnp.maximum(jnp.sum(ew1c * s_t, axis=0, keepdims=True), 0.0)        # (1, 64)
    e = jax.nn.sigmoid(ew2c * hr)                                            # (32, 64)

    # Broadcast the gate back over length with the precomputed 0/1 expansion matmul.
    e_full = jnp.dot(e, exp_ref[...], preferred_element_type=jnp.float32)    # (32, 1024)

    # Padded rows of d and f are exactly zero (zero-padded weights/shifts), so the
    # padded output rows come out as 0 and the full 32-row store is unmasked.
    out_ref[...] = jnp.maximum(d + f * e_full, 0.0)


def _full_spec(shape):
    return pl.BlockSpec(shape, lambda i: tuple(0 for _ in shape))


def _pool_expand(b_tile, l):
    """Host-side 0/1 pooling / expansion matrices shared by every grid step."""
    col_batch = np.arange(b_tile * l) // l                                   # column -> batch
    expand = (col_batch[None, :] == np.arange(b_tile)[:, None]).astype(np.float32)
    pool = expand.T / np.float32(l)
    return jnp.asarray(pool), jnp.asarray(expand)                            # (cols,bt), (bt,cols)


def prepare_params(raw):
    """Fold BN scales into conv weights, transpose for the channels-major kernel
    layout, zero-pad to sublane-aligned row counts, pack small vectors into one slab."""
    (w1, bn1s, bn1b, w2, bn2s, bn2b, wd, bnds, bndb, ew1, ew2) = raw
    w1f = w1 * bn1s[None, :]              # (C_IN, 30)
    w2f = w2 * bn2s[None, :]              # (30, 30)
    wdf = wd * bnds[None, :]              # (C_IN, 30)

    wct = jnp.zeros((2 * C_PAD, C_IN), jnp.float32)
    wct = wct.at[0:C_MID, :].set(w1f.T)
    wct = wct.at[C_PAD:C_PAD + C_MID, :].set(wdf.T)

    w2t = jnp.zeros((C_PAD, C_PAD), jnp.float32)
    w2t = w2t.at[0:C_MID, 0:C_MID].set(w2f.T)

    vec = jnp.zeros((C_PAD, 8), jnp.float32)
    vec = vec.at[0:C_MID, 0].set(bn1b)
    vec = vec.at[0:C_MID, 1].set(bn2b)
    vec = vec.at[0:C_MID, 2].set(bndb)
    vec = vec.at[0:C_MID, 3].set(ew2)
    vec = vec.at[0:C_MID, 4].set(ew1)
    return wct, w2t, vec


def afr_forward(I_ncl, raw_params):
    """I_ncl: (B, C_IN, L) float32 in PyTorch NCL layout. Returns (B, C_MID, L)."""
    b, cin, l = I_ncl.shape
    assert (b, cin, l) == (B, C_IN, L) and b % B_TILE == 0
    wct, w2t, vec = prepare_params(raw_params)
    pool, expand = _pool_expand(B_TILE, l)

    # Channels-major slab: x_t[c, b*L + l] = I[b, c, l].
    # TODO(synk): have the upstream producer emit this (C_IN, B*L) slab directly and let
    # the consumer accept the padded (C_PAD, B*L) output; the NCL<->slab transposes here
    # move more HBM bytes than the kernel itself.
    x_t = jnp.transpose(I_ncl, (1, 0, 2)).reshape(C_IN, b * l)
    cols = B_TILE * l
    grid = (b // B_TILE,)

    n_steps = b // B_TILE
    flops = n_steps * 2 * cols * (2 * C_PAD * C_IN      # fused conv1 + downsample
                                  + C_PAD * C_PAD       # conv2
                                  + C_PAD * B_TILE      # pooling matmul
                                  + C_PAD * B_TILE)     # expansion matmul
    bytes_accessed = (x_t.size + C_PAD * b * l + wct.size + w2t.size + vec.size
                      + pool.size + expand.size) * 4

    out_t = pl.pallas_call(
        afr_kernel,
        out_shape=jax.ShapeDtypeStruct((C_PAD, b * l), jnp.float32),
        grid_spec=pltpu.PrefetchScalarGridSpec(
            num_scalar_prefetch=0,
            grid=grid,
            in_specs=[
                pl.BlockSpec((C_IN, cols), lambda i: (0, i)),
                _full_spec(wct.shape),
                _full_spec(w2t.shape),
                _full_spec(vec.shape),
                _full_spec(pool.shape),
                _full_spec(expand.shape),
            ],
            out_specs=pl.BlockSpec((C_PAD, cols), lambda i: (0, i)),
        ),
        compiler_params=pltpu.CompilerParams(
            dimension_semantics=("parallel",)),
        cost_estimate=pl.CostEstimate(
            flops=flops,
            transcendentals=b * C_PAD,
            bytes_accessed=bytes_accessed),
    )(x_t, wct, w2t, vec, pool, expand)

    # Drop the zero padding rows and return PyTorch NCL layout (B, 30, L).
    return jnp.transpose(out_t[0:C_MID, :].reshape(C_MID, b, l), (1, 0, 2))


def fold_bn(gamma, beta, mean, var, eps=BN_EPS):
    scale = gamma / jnp.sqrt(var + eps)
    shift = beta - mean * scale
    return scale, shift


def init_params(key):
    ks = jax.random.split(key, 8)
    # Conv1d weights (out, in, k=1) stored transposed as (in, out).
    w1 = jax.random.normal(ks[0], (C_IN, C_MID), jnp.float32) * 0.05
    w2 = jax.random.normal(ks[1], (C_MID, C_MID), jnp.float32) * 0.1
    wd = jax.random.normal(ks[2], (C_IN, C_MID), jnp.float32) * 0.05

    def bn(k):
        kg, kb, km, kv = jax.random.split(k, 4)
        gamma = 1.0 + 0.1 * jax.random.normal(kg, (C_MID,), jnp.float32)
        beta = 0.1 * jax.random.normal(kb, (C_MID,), jnp.float32)
        mean = 0.1 * jax.random.normal(km, (C_MID,), jnp.float32)
        var = 1.0 + 0.1 * jax.random.uniform(kv, (C_MID,), jnp.float32)
        return fold_bn(gamma, beta, mean, var)

    bn1s, bn1b = bn(ks[3])
    bn2s, bn2b = bn(ks[4])
    bnds, bndb = bn(ks[5])

    ew1 = jax.random.normal(ks[6], (C_MID,), jnp.float32) * 0.3   # Linear(30->1) weight
    ew2 = jax.random.normal(ks[7], (C_MID,), jnp.float32) * 0.3   # Linear(1->30) weight
    return (w1, bn1s, bn1b, w2, bn2s, bn2b, wd, bnds, bndb, ew1, ew2)


def afr_reference(I_ncl, raw):
    """Pure-JAX reference mirroring the PyTorch forward (inference-mode BN)."""
    (w1, bn1s, bn1b, w2, bn2s, bn2b, wd, bnds, bndb, ew1, ew2) = raw
    x = jnp.transpose(I_ncl, (0, 2, 1))                          # (B, L, Cin)
    h = jnp.maximum(jnp.einsum('blc,cm->blm', x, w1) * bn1s + bn1b, 0.0)
    f = jnp.einsum('blm,mn->bln', h, w2) * bn2s + bn2b           # (B, L, 30)
    s = jnp.mean(f, axis=1)                                      # (B, 30)
    hr = jnp.maximum(jnp.sum(s * ew1, axis=-1, keepdims=True), 0.0)
    e = jax.nn.sigmoid(hr * ew2)                                 # (B, 30)
    o = f * e[:, None, :]
    d = jnp.einsum('blc,cm->blm', x, wd) * bnds + bndb
    out = jnp.maximum(d + o, 0.0)                                # (B, L, 30)
    return jnp.transpose(out, (0, 2, 1))                         # (B, 30, L)


if __name__ == "__main__":
    key = jax.random.PRNGKey(0)
    k_in, k_par = jax.random.split(key)
    I = jax.random.normal(k_in, (B, C_IN, L), jnp.float32)       # PyTorch NCL input
    params = init_params(k_par)

    out = jax.block_until_ready(afr_forward(I, params))
    ref = afr_reference(I, params)
    assert out.shape == (B, C_MID, L)
    np.testing.assert_allclose(np.asarray(out), np.asarray(ref), rtol=1e-4, atol=2e-4)

    print("KERNEL_OK")
</pallas_src>

<mosaic_0001>
module attributes {stable_mosaic.version = 11 : i64} {
  func.func @afr_kernel(%arg0: i32, %arg1: memref<128x1024xf32, #tpu.memory_space<vmem>>, %arg2: memref<64x128xf32, #tpu.memory_space<vmem>>, %arg3: memref<32x32xf32, #tpu.memory_space<vmem>>, %arg4: memref<32x8xf32, #tpu.memory_space<vmem>>, %arg5: memref<1024x64xf32, #tpu.memory_space<vmem>>, %arg6: memref<64x1024xf32, #tpu.memory_space<vmem>>, %arg7: memref<32x1024xf32, #tpu.memory_space<vmem>>) attributes {dimension_semantics = [#tpu.dimension_semantics<parallel>], iteration_bounds = array<i64: 2>, scalar_prefetch = 0 : i64, scratch_operands = 0 : i64, tpu.core_type = #tpu.core_type<tc>, window_params = [{transform_indices = @transform_0, window_bounds = array<i64: 128, 1024>}, {pipeline_mode = #tpu.pipeline_mode<synchronous>, transform_indices = @transform_1, window_bounds = array<i64: 64, 128>}, {pipeline_mode = #tpu.pipeline_mode<synchronous>, transform_indices = @transform_2, window_bounds = array<i64: 32, 32>}, {pipeline_mode = #tpu.pipeline_mode<synchronous>, transform_indices = @transform_3, window_bounds = array<i64: 32, 8>}, {pipeline_mode = #tpu.pipeline_mode<synchronous>, transform_indices = @transform_4, window_bounds = array<i64: 1024, 64>}, {pipeline_mode = #tpu.pipeline_mode<synchronous>, transform_indices = @transform_5, window_bounds = array<i64: 64, 1024>}, {transform_indices = @transform_6, window_bounds = array<i64: 32, 1024>}]} {
    %c0 = arith.constant 0 : index
    %c0_0 = arith.constant 0 : index
    %0 = vector.load %arg1[%c0, %c0_0] : memref<128x1024xf32, #tpu.memory_space<vmem>>, vector<128x1024xf32>
    %c0_1 = arith.constant 0 : index
    %c0_2 = arith.constant 0 : index
    %1 = vector.load %arg4[%c0_1, %c0_2] : memref<32x8xf32, #tpu.memory_space<vmem>>, vector<32x1xf32>
    %c0_3 = arith.constant 0 : index
    %c1 = arith.constant 1 : index
    %2 = vector.load %arg4[%c0_3, %c1] : memref<32x8xf32, #tpu.memory_space<vmem>>, vector<32x1xf32>
    %c0_4 = arith.constant 0 : index
    %c2 = arith.constant 2 : index
    %3 = vector.load %arg4[%c0_4, %c2] : memref<32x8xf32, #tpu.memory_space<vmem>>, vector<32x1xf32>
    %c0_5 = arith.constant 0 : index
    %c3 = arith.constant 3 : index
    %4 = vector.load %arg4[%c0_5, %c3] : memref<32x8xf32, #tpu.memory_space<vmem>>, vector<32x1xf32>
    %c0_6 = arith.constant 0 : index
    %c4 = arith.constant 4 : index
    %5 = vector.load %arg4[%c0_6, %c4] : memref<32x8xf32, #tpu.memory_space<vmem>>, vector<32x1xf32>
    %c0_7 = arith.constant 0 : index
    %c0_8 = arith.constant 0 : index
    %6 = vector.load %arg2[%c0_7, %c0_8] : memref<64x128xf32, #tpu.memory_space<vmem>>, vector<64x128xf32>
    %cst = arith.constant dense<0.000000e+00> : vector<64x1024xf32>
    %7 = tpu.matmul %6, %0, %cst {dimension_numbers = #tpu.dot_dimension_numbers<[1], [0], [0], [1], [0, 0, 1, 1], [], []>} : vector<64x128xf32>, vector<128x1024xf32>, vector<64x1024xf32> -> vector<64x1024xf32>
    %8 = vector.extract_strided_slice %7 {offsets = [0, 0], sizes = [32, 1024], strides = [1, 1]} : vector<64x1024xf32> to vector<32x1024xf32>
    %9 = vector.broadcast %1 : vector<32x1xf32> to vector<32x1024xf32>
    %10 = arith.addf %8, %9 : vector<32x1024xf32>
    %cst_9 = arith.constant 0.000000e+00 : f32
    %11 = vector.broadcast %cst_9 : f32 to vector<32x1024xf32>
    %12 = arith.maximumf %10, %11 : vector<32x1024xf32>
    %13 = vector.extract_strided_slice %7 {offsets = [32, 0], sizes = [32, 1024], strides = [1, 1]} : vector<64x1024xf32> to vector<32x1024xf32>
    %14 = vector.broadcast %3 : vector<32x1xf32> to vector<32x1024xf32>
    %15 = arith.addf %13, %14 : vector<32x1024xf32>
    %c0_10 = arith.constant 0 : index
    %c0_11 = arith.constant 0 : index
    %16 = vector.load %arg3[%c0_10, %c0_11] : memref<32x32xf32, #tpu.memory_space<vmem>>, vector<32x32xf32>
    %cst_12 = arith.constant dense<0.000000e+00> : vector<32x1024xf32>
    %17 = tpu.matmul %16, %12, %cst_12 {dimension_numbers = #tpu.dot_dimension_numbers<[1], [0], [0], [1], [0, 0, 1, 1], [], []>} : vector<32x32xf32>, vector<32x1024xf32>, vector<32x1024xf32> -> vector<32x1024xf32>
    %18 = vector.broadcast %2 : vector<32x1xf32> to vector<32x1024xf32>
    %19 = arith.addf %17, %18 : vector<32x1024xf32>
    %c0_13 = arith.constant 0 : index
    %c0_14 = arith.constant 0 : index
    %20 = vector.load %arg5[%c0_13, %c0_14] : memref<1024x64xf32, #tpu.memory_space<vmem>>, vector<1024x64xf32>
    %cst_15 = arith.constant dense<0.000000e+00> : vector<32x64xf32>
    %21 = tpu.matmul %19, %20, %cst_15 {dimension_numbers = #tpu.dot_dimension_numbers<[1], [0], [0], [1], [0, 0, 1, 1], [], []>} : vector<32x1024xf32>, vector<1024x64xf32>, vector<32x64xf32> -> vector<32x64xf32>
    %22 = vector.broadcast %5 : vector<32x1xf32> to vector<32x64xf32>
    %23 = arith.mulf %22, %21 : vector<32x64xf32>
    %cst_16 = arith.constant dense<0.000000e+00> : vector<64xf32>
    %24 = vector.multi_reduction <add>, %23, %cst_16 [0] : vector<32x64xf32> to vector<64xf32>
    %25 = vector.shape_cast %24 : vector<64xf32> to vector<1x64xf32>
    %cst_17 = arith.constant 0.000000e+00 : f32
    %26 = vector.broadcast %cst_17 : f32 to vector<1x64xf32>
    %27 = arith.maximumf %25, %26 : vector<1x64xf32>
    %28 = vector.broadcast %4 : vector<32x1xf32> to vector<32x64xf32>
    %29 = vector.broadcast %27 : vector<1x64xf32> to vector<32x64xf32>
    %30 = arith.mulf %28, %29 : vector<32x64xf32>
    %31 = arith.negf %30 : vector<32x64xf32>
    %32 = math.exp %31 : vector<32x64xf32>
    %cst_18 = arith.constant 1.000000e+00 : f32
    %33 = vector.broadcast %cst_18 : f32 to vector<32x64xf32>
    %34 = arith.addf %33, %32 : vector<32x64xf32>
    %35 = arith.divf %33, %34 : vector<32x64xf32>
    %c0_19 = arith.constant 0 : index
    %c0_20 = arith.constant 0 : index
    %36 = vector.load %arg6[%c0_19, %c0_20] : memref<64x1024xf32, #tpu.memory_space<vmem>>, vector<64x1024xf32>
    %cst_21 = arith.constant dense<0.000000e+00> : vector<32x1024xf32>
    %37 = tpu.matmul %35, %36, %cst_21 {dimension_numbers = #tpu.dot_dimension_numbers<[1], [0], [0], [1], [0, 0, 1, 1], [], []>} : vector<32x64xf32>, vector<64x1024xf32>, vector<32x1024xf32> -> vector<32x1024xf32>
    %38 = arith.mulf %19, %37 : vector<32x1024xf32>
    %39 = arith.addf %15, %38 : vector<32x1024xf32>
    %cst_22 = arith.constant 0.000000e+00 : f32
    %40 = vector.broadcast %cst_22 : f32 to vector<32x1024xf32>
    %41 = arith.maximumf %39, %40 : vector<32x1024xf32>
    %c0_23 = arith.constant 0 : index
    %c0_24 = arith.constant 0 : index
    %42 = vector.load %arg7[%c0_23, %c0_24] : memref<32x1024xf32, #tpu.memory_space<vmem>>, vector<32x1024xf32>
    tpu.vector_store %arg7[%c0_23, %c0_24], %41 {strides = array<i32>} : memref<32x1024xf32, #tpu.memory_space<vmem>>, vector<32x1024xf32>,
    return
  }
  func.func @transform_0(%arg0: i32) -> (i32, i32) {
    %c0_i32 = arith.constant 0 : i32
    %c0_i32_0 = arith.constant 0 : i32
    return %c0_i32, %arg0 : i32, i32
  }
  func.func @transform_1(%arg0: i32) -> (i32, i32) {
    %c0_i32 = arith.constant 0 : i32
    %c0_i32_0 = arith.constant 0 : i32
    %c0_i32_1 = arith.constant 0 : i32
    return %c0_i32, %c0_i32_0 : i32, i32
  }
  func.func @transform_2(%arg0: i32) -> (i32, i32) {
    %c0_i32 = arith.constant 0 : i32
    %c0_i32_0 = arith.constant 0 : i32
    %c0_i32_1 = arith.constant 0 : i32
    return %c0_i32, %c0_i32_0 : i32, i32
  }
  func.func @transform_3(%arg0: i32) -> (i32, i32) {
    %c0_i32 = arith.constant 0 : i32
    %c0_i32_0 = arith.constant 0 : i32
    %c0_i32_1 = arith.constant 0 : i32
    return %c0_i32, %c0_i32_0 : i32, i32
  }
  func.func @transform_4(%arg0: i32) -> (i32, i32) {
    %c0_i32 = arith.constant 0 : i32
    %c0_i32_0 = arith.constant 0 : i32
    %c0_i32_1 = arith.constant 0 : i32
    return %c0_i32, %c0_i32_0 : i32, i32
  }
  func.func @transform_5(%arg0: i32) -> (i32, i32) {
    %c0_i32 = arith.constant 0 : i32
    %c0_i32_0 = arith.constant 0 : i32
    %c0_i32_1 = arith.constant 0 : i32
    return %c0_i32, %c0_i32_0 : i32, i32
  }
  func.func @transform_6(%arg0: i32) -> (i32, i32) {
    %c0_i32 = arith.constant 0 : i32
    %c0_i32_0 = arith.constant 0 : i32
    return %c0_i32, %arg0 : i32, i32
  }
}

</mosaic_0001>

<bundles_post_ra>
// kernel: tpu_custom_call.1
= control target key start
LH: loop header
LB: loop body
LE: loop exit
PB: predicated region body
PF: predicated region fallthrough
CT: control target
= control target key end

     0   :  { %11 = vsyncpa [#allocation3], 0  ;;  %s4516_s0 = inlined_call_operand.hbm [shape: f32[128,2048], index: 0, kind: input, shape index: {}]   ;;  %s4517_s1 = inlined_call_operand.vmem [shape: f32[64,128], index: 1, kind: input, shape index: {}]   ;;  %s4518_s2 = inlined_call_operand.vmem [shape: f32[32,32], index: 2, kind: input, shape index: {}]   ;;  %s4519_s3 = inlined_call_operand.vmem [shape: f32[32,8], index: 3, kind: input, shape index: {}]   ;;  %s4520_s4 = inlined_call_operand.vmem [shape: f32[1024,64], index: 4, kind: input, shape index: {}]   ;;  %s4521_s5 = inlined_call_operand.vmem [shape: f32[64,1024], index: 5, kind: input, shape index: {}]   ;;  %s4522_s6 = inlined_call_operand.hbm [shape: f32[32,2048], index: 6, kind: output, shape index: {}]  }
   0x1   :  { %13 = vsyncpa [#allocation3 + $0x1], 0 }
   0x2   :  { %14 = vsyncpa [#allocation4], 0 }
   0x3   :  { %16 = vsyncpa [#allocation4 + $0x1], 0  ;;  %s3035_s21 = smov 0   ;;  %s3037_s22 = smov 0  }
   0x4   :  { %s3039_s23 = smov 0   ;;  %s3041_s24 = smov 0  }
   0x5 LB: > { %s3056_s25 = sadd.s32 4294967295, %s2984_s24   ;;  %s2579_s26 = sadd.s32 4294967294, %s2984_s24   ;;  %s2984_s24 = sphi %s3041_s24, %s4639_s24   ;;  %s2980_s23 = sphi %s3039_s23, %s4638_s23   ;;  %s2976_s22 = sphi %s3037_s22, %s4637_s22   ;;  %s2972_s21 = sphi %s3035_s21, %s4636_s21  }
   0x6   : > { %s3060_s27 = sadd.s32 1, %s2984_s24   ;;  %s29_s28 = sadd.s32 1, %s2980_s23 }
   0x7   : > { %s26_s29 = ssub.s32 %s2984_s24, %s3060_s27  ;;  %p36_p0 = scmp.ne.s32.totalorder %s2980_s23, %s2976_s22 }
   0x8   : > { %p27_p1 = scmp.eq.s32.totalorder %s26_s29, 0  ;;  %p37_p2 = scmp.eq.s32.totalorder %s2984_s24, 0 }
   0x9   : > { %p42_p3 = scmp.ne.s32.totalorder %s2976_s22, %s2972_s21  ;;  %p43_p4 = scmp.eq.s32.totalorder %s3056_s25, 0 }
   0xa   : > { %s3072_s30 = scalar_select %p27_p1, %s2980_s23, %s29_s28  }
   0xb   : > { %p3074_p5 = por %p37_p2, %p36_p0  ;;  %p3078_p6 = por %p43_p4, %p42_p3 }
   0xc   : > { %p171_p7 = scmp.eq.s32.totalorder %s3056_s25, 1  ;;  %p177_p8 = scmp.eq.s32.totalorder %s2579_s26, 1 }
   0xd   : > { %s4548_s8 = scalar_select %p3078_p6, 1, 0 }
   0xe   : > { %p2819_p10 = scmp.lt.s32.totalorder %s2984_s24, 2  ;;  %p3085_p11 = por %p171_p7, %p36_p0 }
   0xf   : > { %p3089_p12 = por %p177_p8, %p42_p3  ;;  %s212_s11 = sand.u32 1, %s2980_s23  }
  0x10   : > { %s4549_s9 = scalar_select %p3085_p11, 1, 0 }
  0x11   : > { %s4550_s10 = scalar_select %p3089_p12, 1, 0 }
  0x12   : > { %s2629_s12 = sshll.u32 %s2984_s24, 10  ;;  %s2582_s13 = sshll.u32 %s212_s11, 10 }
  0x13   : > { %s3098_s16 = scalar_lea.hbm %s4516_s0, %s2629_s12  ;;  %s216_s17 = scalar_lea.vmem [#allocation2], %s2582_s13 }
  0x14   : > { %s223_s18 = sshll.u32 %s216_s17, 4  ;;  %p3102_p13 = pnand %p2819_p10, %p3074_p5  ;;  %s3106_s18 = int_to_ptr.vmem [resolvable:$true] %s223_s18 }
  0x15   : > { %s3109_s20 = scalar_lea.sflag [#allocation3], %s212_s11  ;;  %s2892_s26 = scalar_lea.hbm %s3098_s16, 16384 }
  0x16   : > { %p2893_p1 = scmp.ne.s32.totalorder %s3098_s16, %s2892_s26  ;;  %p2894_p2 = pneg %p3102_p13 }
  0x17   : > { %s2897_s7 = scalar_lea.hbm %s4516_s0, 32768  ;;  %p2898_p5 = scmp.lt.s32.totalorder %s3098_s16, %s4516_s0 }
  0x18   : > { %p2895_p3 = pnand %p2894_p2, %p2893_p1  ;;  %p2899_p7 = scmp.lt.s32.totalorder %s2897_s7, %s2892_s26 }
  0x1a   : > { %p2896_p4 = pneg %p2895_p3  ;;  %p2900_p8 = por %p2899_p7, %p2898_p5 }
  0x1c   : > { %p2901_p10 = pnand %p2900_p8, %p2896_p4 }
  0x1e   : > { %2904 = shalt.err (!%p2901_p10)
}
  0x1f   : > { %s2905_s11 = scalar_lea.vmem %s3106_s18, 16384  ;;  %s2986_s14 = smov [#allocation2]  }
  0x20   : > { %p2906_p9 = scmp.ne.s32.totalorder %s3106_s18, %s2905_s11  ;;  %s2910_s15 = sshll.u32 %s2986_s14, 4  ;;  %s2911_s15 = int_to_ptr.vmem [resolvable:$false] %s2910_s15 }
  0x21   : > { %s2912_s17 = scalar_lea.vmem %s2911_s15, 32768  ;;  %p2913_p3 = scmp.lt.s32.totalorder %s3106_s18, %s2911_s15 }
  0x22   : > { %p2908_p0 = pnand %p2906_p9, %p2894_p2  ;;  %p2914_p12 = scmp.lt.s32.totalorder %s2912_s17, %s2905_s11 }
  0x24   : > { %p2909_p1 = pneg %p2908_p0  ;;  %p2915_p11 = por %p2914_p12, %p2913_p3 }
  0x26   : > { %p2916_p6 = pnand %p2915_p11, %p2909_p1 }
  0x28   : > { %2919 = shalt.err (!%p2916_p6)
}
  0x29   : > { %s2987_s26 = smov 2048   ;;  %s2988_s28 = smov 1024  }
  0x2a   : > { %s2989_s29 = smov 64   ;;  %p231_p9 = scmp.lt.s32.totalorder %s2984_s24, 3 }
  0x2b   : > { %2814 = dma.hbm_to_vmem [thread:$0]  (!%p3102_p13), %s3098_s16, 16384, %s3106_s18, %s3109_s20, %s2987_s26, %s2988_s28, %s2989_s29  }
  0x2c   : > { %p4552_p0 = scmp.ge.s32.totalorder %s2984_s24, 1 }
  0x2e   : > { %p232_p2 = pnand %p4552_p0, %p231_p9 }
  0x30   : > { %235 = sbr.rel (%p232_p2) target bundleno = 1075 (0x433), region = 44 }
  0x35   : > { %s3134_s7 = sand.u32 1, %s2976_s22   ;;  %p4553_p6 = scmp.ne.s32.totalorder %s4548_s8, 0 }
  0x36   : > { %s2586_s12 = sshll.u32 %s3134_s7, 10  ;;  %s238_s13 = scalar_lea.sflag [#allocation3], %s3134_s7 }
  0x37   : > { %s3138_s11 = scalar_lea.vmem [#allocation2], %s2586_s12 }
  0x38   : > { %2963 = dma.done.wait (%p4553_p6), %s238_s13, 16384  }
  0x39   : > { %2965 = vsyncadd (%p4553_p6), %s238_s13, 4294950912  ;;  %v4525_v0 = vmov 0.0   ;;  %v2991_v1 = vmov 0   ;;  %v393_v2 = vld [vmem:[%s3138_s11 + $0x3c8] sm:$0xff]  ;;  %v395_v3 = vld [vmem:[%s3138_s11 + $0x3d8] sm:$0xff]  ;;  %vm1016_vm0 = vcmask 261120  }
  0x3a   : > { %476 = vmatprep.mubr.f32.mxu0 %v4525_v0  ;;  %589 = vmatprep.mubr.f32.mxu1 %v4525_v0  ;;  %v392_v4 = vld [vmem:[%s3138_s11 + $0x3c0] sm:$0xff]  ;;  %v394_v5 = vld [vmem:[%s3138_s11 + $0x3d0] sm:$0xff]  ;;  %v385_v6 = vld [vmem:[%s3138_s11 + $0x388] sm:$0xff]  ;;  %vm1873_vm1 = vcmask 523264   ;;  %s2587_s29 = sshll.u32 %s3134_s7, 8  ;;  %s2630_s13 = sshll.u32 %s3056_s25, 10 }
  0x3b   : > { %2866 = vset.pattern.permute.xlu1 %v2991_v1  ;;  %2865 = vset.pattern.permute.xlu0 %v2991_v1  ;;  %v387_v7 = vld [vmem:[%s3138_s11 + $0x398] sm:$0xff]  ;;  %v384_v8 = vld [vmem:[%s3138_s11 + $0x380] sm:$0xff]  ;;  %v386_v9 = vld [vmem:[%s3138_s11 + $0x390] sm:$0xff]  ;;  %s4350_s12 = scalar_lea.vmem [#allocation5], %s2587_s29  ;;  %s4465_s18 = scalar_lea.hbm %s4522_s6, %s2630_s13 }
  0x3c   : > { %412 = vmatprep.subr.mxu0 %v393_v2  ;;  %525 = vmatprep.subr.mxu1 %v395_v3  ;;  %v377_v10 = vld [vmem:[%s3138_s11 + $0x348] sm:$0xff]  ;;  %v379_v11 = vld [vmem:[%s3138_s11 + $0x358] sm:$0xff]  ;;  %v376_v12 = vld [vmem:[%s3138_s11 + $0x340] sm:$0xff]  ;;  %s2506_s8 = sshll.u32 %s4350_s12, 4  ;;  %s2493_s19 = scalar_lea.sflag [#allocation4], %s3134_s7  ;;  %s4469_s8 = int_to_ptr.vmem [resolvable:$true] %s2506_s8 }
  0x3d   : > { %413 = vmatpush1.msra.mxu0 %v392_v4  ;;  %526 = vmatpush1.msra.mxu1 %v394_v5  ;;  %v378_v13 = vld [vmem:[%s3138_s11 + $0x350] sm:$0xff]  ;;  %v369_v14 = vld [vmem:[%s3138_s11 + $0x308] sm:$0xff]  ;;  %v371_v15 = vld [vmem:[%s3138_s11 + $0x318] sm:$0xff]  ;;  %s2920_s20 = scalar_lea.vmem %s4469_s8, 4096  ;;  %p4633_p12 = scmp.ne.s32.totalorder %s4549_s9, 0 }
  0x3e   : > { %414 = vmatprep.subr.mxu0 %v385_v6  ;;  %527 = vmatprep.subr.mxu1 %v387_v7  ;;  %v368_v16 = vld [vmem:[%s3138_s11 + $0x300] sm:$0xff]  ;;  %v370_v17 = vld [vmem:[%s3138_s11 + $0x310] sm:$0xff]  ;;  %v361_v18 = vld [vmem:[%s3138_s11 + $0x2c8] sm:$0xff]  ;;  %p2921_p11 = scmp.ne.s32.totalorder %s4469_s8, %s2920_s20  ;;  %s2996_s14 = smov [#allocation5]  }
  0x3f   : > { %415 = vmatpush1.msra.mxu0 %v384_v8  ;;  %528 = vmatpush1.msra.mxu1 %v386_v9  ;;  %v363_v19 = vld [vmem:[%s3138_s11 + $0x2d8] sm:$0xff]  ;;  %v360_v20 = vld [vmem:[%s3138_s11 + $0x2c0] sm:$0xff]  ;;  %v362_v21 = vld [vmem:[%s3138_s11 + $0x2d0] sm:$0xff]  ;;  %s2924_s15 = sshll.u32 %s2996_s14, 4  ;;  %s2925_s15 = int_to_ptr.vmem [resolvable:$false] %s2924_s15 }
  0x40   : > { %416 = vmatprep.subr.mxu0 %v377_v10  ;;  %529 = vmatprep.subr.mxu1 %v379_v11  ;;  %v353_v22 = vld [vmem:[%s3138_s11 + $0x288] sm:$0xff]  ;;  %v355_v23 = vld [vmem:[%s3138_s11 + $0x298] sm:$0xff]  ;;  %v352_v24 = vld [vmem:[%s3138_s11 + $0x280] sm:$0xff]  ;;  %p2922_p13 = pnand %p2921_p11, %p4633_p12  ;;  %p2927_p5 = scmp.lt.s32.totalorder %s4469_s8, %s2925_s15 }
  0x41   : > { %417 = vmatpush1.msra.mxu0 %v376_v12  ;;  %530 = vmatpush1.msra.mxu1 %v378_v13  ;;  %v354_v25 = vld [vmem:[%s3138_s11 + $0x290] sm:$0xff]  ;;  %v345_v26 = vld [vmem:[%s3138_s11 + $0x248] sm:$0xff]  ;;  %v347_v27 = vld [vmem:[%s3138_s11 + $0x258] sm:$0xff] }
  0x42   : > { %418 = vmatprep.subr.mxu0 %v369_v14  ;;  %531 = vmatprep.subr.mxu1 %v371_v15  ;;  %v344_v28 = vld [vmem:[%s3138_s11 + $0x240] sm:$0xff]  ;;  %v346_v29 = vld [vmem:[%s3138_s11 + $0x250] sm:$0xff]  ;;  %v337_v30 = vld [vmem:[%s3138_s11 + $0x208] sm:$0xff]  ;;  %p2923_p4 = pneg %p2922_p13 }
  0x43   : > { %419 = vmatpush1.msra.mxu0 %v368_v16  ;;  %532 = vmatpush1.msra.mxu1 %v370_v17  ;;  %v339_v31 = vld [vmem:[%s3138_s11 + $0x218] sm:$0xff]  ;;  %v336_v32 = vld [vmem:[%s3138_s11 + $0x200] sm:$0xff]  ;;  %v338_v33 = vld [vmem:[%s3138_s11 + $0x210] sm:$0xff] }
  0x44   : > { %420 = vmatprep.subr.mxu0 %v361_v18  ;;  %533 = vmatprep.subr.mxu1 %v363_v19  ;;  %v329_v34 = vld [vmem:[%s3138_s11 + $0x1c8] sm:$0xff]  ;;  %v331_v35 = vld [vmem:[%s3138_s11 + $0x1d8] sm:$0xff]  ;;  %v328_v36 = vld [vmem:[%s3138_s11 + $0x1c0] sm:$0xff] }
  0x45   : > { %421 = vmatpush1.msra.mxu0 %v360_v20  ;;  %534 = vmatpush1.msra.mxu1 %v362_v21  ;;  %v330_v37 = vld [vmem:[%s3138_s11 + $0x1d0] sm:$0xff]  ;;  %v321_v38 = vld [vmem:[%s3138_s11 + $0x188] sm:$0xff]  ;;  %v323_v39 = vld [vmem:[%s3138_s11 + $0x198] sm:$0xff] }
  0x46   : > { %422 = vmatprep.subr.mxu0 %v353_v22  ;;  %535 = vmatprep.subr.mxu1 %v355_v23  ;;  %v320_v40 = vld [vmem:[%s3138_s11 + $0x180] sm:$0xff]  ;;  %v322_v41 = vld [vmem:[%s3138_s11 + $0x190] sm:$0xff]  ;;  %v313_v42 = vld [vmem:[%s3138_s11 + $0x148] sm:$0xff] }
  0x47   : > { %423 = vmatpush1.msra.mxu0 %v352_v24  ;;  %536 = vmatpush1.msra.mxu1 %v354_v25  ;;  %v315_v43 = vld [vmem:[%s3138_s11 + $0x158] sm:$0xff]  ;;  %v312_v44 = vld [vmem:[%s3138_s11 + $0x140] sm:$0xff]  ;;  %v314_v45 = vld [vmem:[%s3138_s11 + $0x150] sm:$0xff] }
  0x48   : > { %424 = vmatprep.subr.mxu0 %v345_v26  ;;  %537 = vmatprep.subr.mxu1 %v347_v27  ;;  %v305_v46 = vld [vmem:[%s3138_s11 + $0x108] sm:$0xff]  ;;  %v307_v47 = vld [vmem:[%s3138_s11 + $0x118] sm:$0xff]  ;;  %v304_v48 = vld [vmem:[%s3138_s11 + $0x100] sm:$0xff] }
  0x49   : > { %425 = vmatpush1.msra.mxu0 %v344_v28  ;;  %538 = vmatpush1.msra.mxu1 %v346_v29  ;;  %v306_v49 = vld [vmem:[%s3138_s11 + $0x110] sm:$0xff]  ;;  %v297_v50 = vld [vmem:[%s3138_s11 + $0xc8] sm:$0xff]  ;;  %v299_v51 = vld [vmem:[%s3138_s11 + $0xd8] sm:$0xff] }
  0x4a   : > { %426 = vmatprep.subr.mxu0 %v337_v30  ;;  %539 = vmatprep.subr.mxu1 %v339_v31  ;;  %v296_v52 = vld [vmem:[%s3138_s11 + $0xc0] sm:$0xff]  ;;  %v298_v53 = vld [vmem:[%s3138_s11 + $0xd0] sm:$0xff]  ;;  %v289_v54 = vld [vmem:[%s3138_s11 + $0x88] sm:$0xff] }
  0x4b   : > { %427 = vmatpush1.msra.mxu0 %v336_v32  ;;  %540 = vmatpush1.msra.mxu1 %v338_v33  ;;  %v291_v55 = vld [vmem:[%s3138_s11 + $0x98] sm:$0xff]  ;;  %v288_v56 = vld [vmem:[%s3138_s11 + $0x80] sm:$0xff]  ;;  %v290_v57 = vld [vmem:[%s3138_s11 + $0x90] sm:$0xff] }
  0x4c   : > { %428 = vmatprep.subr.mxu0 %v329_v34  ;;  %541 = vmatprep.subr.mxu1 %v331_v35  ;;  %v281_v58 = vld [vmem:[%s3138_s11 + $0x48] sm:$0xff]  ;;  %v283_v59 = vld [vmem:[%s3138_s11 + $0x58] sm:$0xff]  ;;  %v280_v60 = vld [vmem:[%s3138_s11 + $0x40] sm:$0xff] }
  0x4d   : > { %429 = vmatpush1.msra.mxu0 %v328_v36  ;;  %542 = vmatpush1.msra.mxu1 %v330_v37  ;;  %v282_v61 = vld [vmem:[%s3138_s11 + $0x50] sm:$0xff]  ;;  %v273_v62 = vld [vmem:[%s3138_s11 + $0x8] sm:$0xff]  ;;  %v275_v63 = vld [vmem:[%s3138_s11 + $0x18] sm:$0xff] }
  0x4e   : > { %430 = vmatprep.subr.mxu0 %v321_v38  ;;  %543 = vmatprep.subr.mxu1 %v323_v39  ;;  %v272_v1 = vld [vmem:[%s3138_s11] sm:$0xff]  ;;  %v274_v2 = vld [vmem:[%s3138_s11 + $0x10] sm:$0xff]  ;;  %v397_v4 = vld [vmem:[%s3138_s11 + $0x3e8] sm:$0xff] }
  0x4f   : > { %431 = vmatpush1.msra.mxu0 %v320_v40  ;;  %544 = vmatpush1.msra.mxu1 %v322_v41  ;;  %v3213_v3 = vld [vmem:[%s4517_s1] sm:$0xff]  ;;  %v399_v5 = vld [vmem:[%s3138_s11 + $0x3f8] sm:$0xff]  ;;  %v398_v7 = vld [vmem:[%s3138_s11 + $0x3f0] sm:$0xff] }
  0x50   : > { %432 = vmatprep.subr.mxu0 %v313_v42  ;;  %545 = vmatprep.subr.mxu1 %v315_v43  ;;  %v396_v6 = vld [vmem:[%s3138_s11 + $0x3e0] sm:$0xff]  ;;  %v389_v8 = vld [vmem:[%s3138_s11 + $0x3a8] sm:$0xff]  ;;  %v391_v9 = vld [vmem:[%s3138_s11 + $0x3b8] sm:$0xff] }
  0x51   : > { %433 = vmatpush1.msra.mxu0 %v312_v44  ;;  %546 = vmatpush1.msra.mxu1 %v314_v45  ;;  %v388_v10 = vld [vmem:[%s3138_s11 + $0x3a0] sm:$0xff]  ;;  %v390_v11 = vld [vmem:[%s3138_s11 + $0x3b0] sm:$0xff]  ;;  %v3228_v12 = vld [vmem:[%s4517_s1 + $0x8] sm:$0xff] }
  0x52   : > { %434 = vmatprep.subr.mxu0 %v305_v46  ;;  %547 = vmatprep.subr.mxu1 %v307_v47  ;;  %v381_v13 = vld [vmem:[%s3138_s11 + $0x368] sm:$0xff]  ;;  %v383_v14 = vld [vmem:[%s3138_s11 + $0x378] sm:$0xff]  ;;  %v380_v15 = vld [vmem:[%s3138_s11 + $0x360] sm:$0xff] }
  0x53   : > { %435 = vmatpush1.msra.mxu0 %v304_v48  ;;  %548 = vmatpush1.msra.mxu1 %v306_v49  ;;  %v382_v16 = vld [vmem:[%s3138_s11 + $0x370] sm:$0xff]  ;;  %v373_v17 = vld [vmem:[%s3138_s11 + $0x328] sm:$0xff]  ;;  %v375_v18 = vld [vmem:[%s3138_s11 + $0x338] sm:$0xff] }
  0x54   : > { %436 = vmatprep.subr.mxu0 %v297_v50  ;;  %549 = vmatprep.subr.mxu1 %v299_v51  ;;  %v372_v19 = vld [vmem:[%s3138_s11 + $0x320] sm:$0xff]  ;;  %v374_v20 = vld [vmem:[%s3138_s11 + $0x330] sm:$0xff]  ;;  %v365_v22 = vld [vmem:[%s3138_s11 + $0x2e8] sm:$0xff] }
  0x55   : > { %437 = vmatpush1.msra.mxu0 %v296_v52  ;;  %550 = vmatpush1.msra.mxu1 %v298_v53  ;;  %v3245_v21 = vld [vmem:[%s4517_s1 + $0x10] sm:$0xff]  ;;  %v367_v23 = vld [vmem:[%s3138_s11 + $0x2f8] sm:$0xff]  ;;  %v364_v24 = vld [vmem:[%s3138_s11 + $0x2e0] sm:$0xff] }
  0x56   : > { %438 = vmatprep.subr.mxu0 %v289_v54  ;;  %551 = vmatprep.subr.mxu1 %v291_v55  ;;  %v366_v25 = vld [vmem:[%s3138_s11 + $0x2f0] sm:$0xff]  ;;  %v357_v26 = vld [vmem:[%s3138_s11 + $0x2a8] sm:$0xff]  ;;  %v359_v27 = vld [vmem:[%s3138_s11 + $0x2b8] sm:$0xff] }
  0x57   : > { %439 = vmatpush1.msra.mxu0 %v288_v56  ;;  %552 = vmatpush1.msra.mxu1 %v290_v57  ;;  %v356_v28 = vld [vmem:[%s3138_s11 + $0x2a0] sm:$0xff]  ;;  %v358_v29 = vld [vmem:[%s3138_s11 + $0x2b0] sm:$0xff]  ;;  %v3262_v30 = vld [vmem:[%s4517_s1 + $0x18] sm:$0xff] }
  0x58   : > { %440 = vmatprep.subr.mxu0 %v281_v58  ;;  %553 = vmatprep.subr.mxu1 %v283_v59  ;;  %v349_v31 = vld [vmem:[%s3138_s11 + $0x268] sm:$0xff]  ;;  %v351_v32 = vld [vmem:[%s3138_s11 + $0x278] sm:$0xff]  ;;  %v348_v33 = vld [vmem:[%s3138_s11 + $0x260] sm:$0xff] }
  0x59   : > { %441 = vmatpush1.msra.mxu0 %v280_v60  ;;  %554 = vmatpush1.msra.mxu1 %v282_v61  ;;  %v350_v34 = vld [vmem:[%s3138_s11 + $0x270] sm:$0xff]  ;;  %v341_v35 = vld [vmem:[%s3138_s11 + $0x228] sm:$0xff]  ;;  %v343_v36 = vld [vmem:[%s3138_s11 + $0x238] sm:$0xff] }
  0x5a   : > { %442 = vmatprep.subr.mxu0 %v273_v62  ;;  %555 = vmatprep.subr.mxu1 %v275_v63  ;;  %v340_v37 = vld [vmem:[%s3138_s11 + $0x220] sm:$0xff]  ;;  %v342_v38 = vld [vmem:[%s3138_s11 + $0x230] sm:$0xff]  ;;  %v333_v40 = vld [vmem:[%s3138_s11 + $0x1e8] sm:$0xff] }
  0x5b   : > { %443 = vmatpush1.msra.mxu0 %v272_v1  ;;  %556 = vmatpush1.msra.mxu1 %v274_v2  ;;  %v3279_v39 = vld [vmem:[%s4517_s1 + $0x20] sm:$0xff]  ;;  %v335_v41 = vld [vmem:[%s3138_s11 + $0x1f8] sm:$0xff]  ;;  %v334_v43 = vld [vmem:[%s3138_s11 + $0x1f0] sm:$0xff] }
  0x5c   : > { %477 = vmatmul.mubr.f32.vlgmr.msra.gmra.mxu0 %v3213_v3  ;;  %590 = vmatmul.mubr.f32.vlgmr.msra.gmra.mxu1 %v3213_v3  ;;  %v332_v42 = vld [vmem:[%s3138_s11 + $0x1e0] sm:$0xff]  ;;  %v325_v44 = vld [vmem:[%s3138_s11 + $0x1a8] sm:$0xff]  ;;  %v327_v45 = vld [vmem:[%s3138_s11 + $0x1b8] sm:$0xff] }
  0x5d   : > { %638 = vmatprep.subr.mxu0 %v397_v4  ;;  %751 = vmatprep.subr.mxu1 %v399_v5  ;;  %v324_v46 = vld [vmem:[%s3138_s11 + $0x1a0] sm:$0xff]  ;;  %v326_v47 = vld [vmem:[%s3138_s11 + $0x1b0] sm:$0xff]  ;;  %v3296_v48 = vld [vmem:[%s4517_s1 + $0x28] sm:$0xff] }
  0x5e   : > { %639 = vmatpush1.msra.mxu0 %v396_v6  ;;  %752 = vmatpush1.msra.mxu1 %v398_v7  ;;  %v317_v49 = vld [vmem:[%s3138_s11 + $0x168] sm:$0xff]  ;;  %v319_v50 = vld [vmem:[%s3138_s11 + $0x178] sm:$0xff]  ;;  %v316_v51 = vld [vmem:[%s3138_s11 + $0x160] sm:$0xff] }
  0x5f   : > { %640 = vmatprep.subr.mxu0 %v389_v8  ;;  %753 = vmatprep.subr.mxu1 %v391_v9  ;;  %v318_v52 = vld [vmem:[%s3138_s11 + $0x170] sm:$0xff]  ;;  %v309_v53 = vld [vmem:[%s3138_s11 + $0x128] sm:$0xff]  ;;  %v311_v54 = vld [vmem:[%s3138_s11 + $0x138] sm:$0xff] }
  0x60   : > { %482 = vmatprep.mubr.f32.mxu0 %v4525_v0  ;;  %595 = vmatprep.mubr.f32.mxu1 %v4525_v0  ;;  %v308_v55 = vld [vmem:[%s3138_s11 + $0x120] sm:$0xff]  ;;  %v310_v56 = vld [vmem:[%s3138_s11 + $0x130] sm:$0xff]  ;;  %v301_v58 = vld [vmem:[%s3138_s11 + $0xe8] sm:$0xff] }
  0x61   : > { %641 = vmatpush1.msra.mxu0 %v388_v10  ;;  %754 = vmatpush1.msra.mxu1 %v390_v11  ;;  %v3313_v57 = vld [vmem:[%s4517_s1 + $0x30] sm:$0xff]  ;;  %v303_v59 = vld [vmem:[%s3138_s11 + $0xf8] sm:$0xff]  ;;  %v300_v60 = vld [vmem:[%s3138_s11 + $0xe0] sm:$0xff] }
  0x62   : > { %483 = vmatmul.mubr.f32.gmra.mxu0 %v3228_v12  ;;  %596 = vmatmul.mubr.f32.gmra.mxu1 %v3228_v12  ;;  %v302_v61 = vld [vmem:[%s3138_s11 + $0xf0] sm:$0xff]  ;;  %v293_v62 = vld [vmem:[%s3138_s11 + $0xa8] sm:$0xff]  ;;  %v295_v63 = vld [vmem:[%s3138_s11 + $0xb8] sm:$0xff] }
  0x63   : > { %642 = vmatprep.subr.mxu0 %v381_v13  ;;  %755 = vmatprep.subr.mxu1 %v383_v14  ;;  %v292_v1 = vld [vmem:[%s3138_s11 + $0xa0] sm:$0xff]  ;;  %v294_v2 = vld [vmem:[%s3138_s11 + $0xb0] sm:$0xff]  ;;  %v3330_v4 = vld [vmem:[%s4517_s1 + $0x38] sm:$0xff] }
  0x64   : > { %643 = vmatpush1.msra.mxu0 %v380_v15  ;;  %756 = vmatpush1.msra.mxu1 %v382_v16  ;;  %v285_v5 = vld [vmem:[%s3138_s11 + $0x68] sm:$0xff]  ;;  %v287_v6 = vld [vmem:[%s3138_s11 + $0x78] sm:$0xff]  ;;  %v284_v7 = vld [vmem:[%s3138_s11 + $0x60] sm:$0xff] }
  0x65   : > { %644 = vmatprep.subr.mxu0 %v373_v17  ;;  %757 = vmatprep.subr.mxu1 %v375_v18  ;;  %v286_v8 = vld [vmem:[%s3138_s11 + $0x70] sm:$0xff]  ;;  %v277_v9 = vld [vmem:[%s3138_s11 + $0x28] sm:$0xff]  ;;  %v279_v10 = vld [vmem:[%s3138_s11 + $0x38] sm:$0xff]  ;;  %v2992_v17 = vmov 1   ;;  %v2994_v18 = vmov 3  }
  0x66   : > { %488 = vmatprep.mubr.f32.mxu0 %v4525_v0  ;;  %601 = vmatprep.mubr.f32.mxu1 %v4525_v0  ;;  %v276_v11 = vld [vmem:[%s3138_s11 + $0x20] sm:$0xff]  ;;  %v278_v13 = vld [vmem:[%s3138_s11 + $0x30] sm:$0xff]  ;;  %v401_v14 = vld [vmem:[%s4519_s3 + $0x8] sm:$0xff]  ;;  %s2926_s11 = scalar_lea.vmem %s2925_s15, 8192 }
  0x67   : > { %645 = vmatpush1.msra.mxu0 %v372_v19  ;;  %758 = vmatpush1.msra.mxu1 %v374_v20  ;;  %v3352_v15 = vld [vmem:[%s4519_s3 + $0x18] sm:$0xff]  ;;  %v400_v16 = vld [vmem:[%s4519_s3] sm:$0xff]  ;;  %v2995_v19 = vmov 2   ;;  %p2928_p7 = scmp.lt.s32.totalorder %s2926_s11, %s2920_s20 }
  0x68   : > { %489 = vmatmul.mubr.f32.gmra.mxu0 %v3245_v21  ;;  %602 = vmatmul.mubr.f32.gmra.mxu1 %v3245_v21 }
  0x69   : > { %646 = vmatprep.subr.mxu0 %v365_v22  ;;  %759 = vmatprep.subr.mxu1 %v367_v23  ;;  %p2929_p8 = por %p2928_p7, %p2927_p5 }
  0x6a   : > { %647 = vmatpush1.msra.mxu0 %v364_v24  ;;  %760 = vmatpush1.msra.mxu1 %v366_v25 }
  0x6b   : > { %648 = vmatprep.subr.mxu0 %v357_v26  ;;  %761 = vmatprep.subr.mxu1 %v359_v27  ;;  %p2930_p10 = pnand %p2929_p8, %p2923_p4 }
  0x6c   : > { %494 = vmatprep.mubr.f32.mxu0 %v4525_v0  ;;  %607 = vmatprep.mubr.f32.mxu1 %v4525_v0 }
  0x6d   : > { %649 = vmatpush1.msra.mxu0 %v356_v28  ;;  %762 = vmatpush1.msra.mxu1 %v358_v29 }
  0x6e   : > { %495 = vmatmul.mubr.f32.gmra.mxu0 %v3262_v30  ;;  %608 = vmatmul.mubr.f32.gmra.mxu1 %v3262_v30 }
  0x6f   : > { %650 = vmatprep.subr.mxu0 %v349_v31  ;;  %763 = vmatprep.subr.mxu1 %v351_v32 }
  0x70   : > { %651 = vmatpush1.msra.mxu0 %v348_v33  ;;  %764 = vmatpush1.msra.mxu1 %v350_v34 }
  0x71   : > { %652 = vmatprep.subr.mxu0 %v341_v35  ;;  %765 = vmatprep.subr.mxu1 %v343_v36 }
  0x72   : > { %500 = vmatprep.mubr.f32.mxu0 %v4525_v0  ;;  %613 = vmatprep.mubr.f32.mxu1 %v4525_v0 }
  0x73   : > { %653 = vmatpush1.msra.mxu0 %v340_v37  ;;  %766 = vmatpush1.msra.mxu1 %v342_v38 }
  0x74   : > { %501 = vmatmul.mubr.f32.gmra.mxu0 %v3279_v39  ;;  %614 = vmatmul.mubr.f32.gmra.mxu1 %v3279_v39 }
  0x75   : > { %654 = vmatprep.subr.mxu0 %v333_v40  ;;  %767 = vmatprep.subr.mxu1 %v335_v41 }
  0x76   : > { %655 = vmatpush1.msra.mxu0 %v332_v42  ;;  %768 = vmatpush1.msra.mxu1 %v334_v43 }
  0x77   : > { %656 = vmatprep.subr.mxu0 %v325_v44  ;;  %769 = vmatprep.subr.mxu1 %v327_v45 }
  0x78   : > { %506 = vmatprep.mubr.f32.mxu0 %v4525_v0  ;;  %619 = vmatprep.mubr.f32.mxu1 %v4525_v0 }
  0x79   : > { %657 = vmatpush1.msra.mxu0 %v324_v46  ;;  %770 = vmatpush1.msra.mxu1 %v326_v47 }
  0x7a   : > { %507 = vmatmul.mubr.f32.gmra.mxu0 %v3296_v48  ;;  %620 = vmatmul.mubr.f32.gmra.mxu1 %v3296_v48 }
  0x7b   : > { %658 = vmatprep.subr.mxu0 %v317_v49  ;;  %771 = vmatprep.subr.mxu1 %v319_v50 }
  0x7c   : > { %659 = vmatpush1.msra.mxu0 %v316_v51  ;;  %772 = vmatpush1.msra.mxu1 %v318_v52 }
  0x7d   : > { %660 = vmatprep.subr.mxu0 %v309_v53  ;;  %773 = vmatprep.subr.mxu1 %v311_v54 }
  0x7e   : > { %512 = vmatprep.mubr.f32.mxu0 %v4525_v0  ;;  %625 = vmatprep.mubr.f32.mxu1 %v4525_v0 }
  0x7f   : > { %661 = vmatpush1.msra.mxu0 %v308_v55  ;;  %774 = vmatpush1.msra.mxu1 %v310_v56 }
  0x80   : > { %513 = vmatmul.mubr.f32.gmra.mxu0 %v3313_v57  ;;  %626 = vmatmul.mubr.f32.gmra.mxu1 %v3313_v57 }
  0x81   : > { %662 = vmatprep.subr.mxu0 %v301_v58  ;;  %775 = vmatprep.subr.mxu1 %v303_v59 }
  0x82   : > { %663 = vmatpush1.msra.mxu0 %v300_v60  ;;  %776 = vmatpush1.msra.mxu1 %v302_v61 }
  0x83   : > { %664 = vmatprep.subr.mxu0 %v293_v62  ;;  %777 = vmatprep.subr.mxu1 %v295_v63 }
  0x84   : > { %518 = vmatprep.mubr.f32.mxu0 %v4525_v0  ;;  %631 = vmatprep.mubr.f32.mxu1 %v4525_v0 }
  0x85   : > { %665 = vmatpush1.msra.mxu0 %v292_v1  ;;  %778 = vmatpush1.msra.mxu1 %v294_v2 }
  0x86   : > { %519 = vmatmul.mubr.f32.gmra.mxu0 %v3330_v4  ;;  %632 = vmatmul.mubr.f32.gmra.mxu1 %v3330_v4 }
  0x87   : > { %666 = vmatprep.subr.mxu0 %v285_v5  ;;  %779 = vmatprep.subr.mxu1 %v287_v6 }
  0x88   : > { %667 = vmatpush1.msra.mxu0 %v284_v7  ;;  %780 = vmatpush1.msra.mxu1 %v286_v8 }
  0x89   : > { %668 = vmatprep.subr.mxu0 %v277_v9  ;;  %781 = vmatprep.subr.mxu1 %v279_v10 }
  0x8a   : > { %669 = vmatpush1.msra.mxu0 %v276_v11  ;;  %702 = vmatprep.mubr.f32.mxu0 %v4525_v0 }
  0x8b   : > { %782 = vmatpush1.msra.mxu1 %v278_v13  ;;  %815 = vmatprep.mubr.f32.mxu1 %v4525_v0 }
  0x8c   : > { %703 = vmatmul.mubr.f32.vlgmr.msra.gmra.mxu0 %v3213_v3  ;;  %816 = vmatmul.mubr.f32.vlgmr.msra.gmra.mxu1 %v3213_v3  ;;  %v402_v3 = vld [vmem:[%s4519_s3 + $0x10] sm:$0xff] }
  0x8d   : > { %708 = vmatprep.mubr.f32.mxu0 %v4525_v0  ;;  %821 = vmatprep.mubr.f32.mxu1 %v4525_v0 }
  0x8e   : > { %871 = vperm.xlu1 %2866, %v401_v14   ;;  %881 = vperm.xlu0 %2865, %v3352_v15  }
  0x90   : > { %709 = vmatmul.mubr.f32.gmra.mxu0 %v3228_v12  ;;  %822 = vmatmul.mubr.f32.gmra.mxu1 %v3228_v12  ;;  %v2993_v12 = vmov 4  }
  0x91   : > { %714 = vmatprep.mubr.f32.mxu0 %v4525_v0  ;;  %827 = vmatprep.mubr.f32.mxu1 %v4525_v0 }
  0x92   : > { %866 = vperm.xlu1 %2866, %v400_v16   ;;  %876 = vperm.xlu0 %2865, %v402_v3  }
  0x94   : > { %715 = vmatmul.mubr.f32.gmra.mxu0 %v3245_v21  ;;  %828 = vmatmul.mubr.f32.gmra.mxu1 %v3245_v21 }
  0x95   : > { %720 = vmatprep.mubr.f32.mxu0 %v4525_v0  ;;  %833 = vmatprep.mubr.f32.mxu1 %v4525_v0 }
  0x96   : > { %2868 = vset.pattern.permute.xlu1 %v2992_v17  ;;  %2867 = vset.pattern.permute.xlu0 %v2992_v17 }
  0x97   : > { %1005 = vperm.xlu1 %2868, %v401_v14   ;;  %1001 = vperm.xlu0 %2867, %v400_v16  }
  0x98   : > { %721 = vmatmul.mubr.f32.gmra.mxu0 %v3262_v30  ;;  %834 = vmatmul.mubr.f32.gmra.mxu1 %v3262_v30 }
  0x99   : > { %726 = vmatprep.mubr.f32.mxu0 %v4525_v0  ;;  %839 = vmatprep.mubr.f32.mxu1 %v4525_v0 }
  0x9b   : > { %1009 = vperm.xlu1 %2868, %v402_v3   ;;  %1013 = vperm.xlu0 %2867, %v3352_v15  }
  0x9c   : > { %727 = vmatmul.mubr.f32.gmra.mxu0 %v3279_v39  ;;  %840 = vmatmul.mubr.f32.gmra.mxu1 %v3279_v39 }
  0x9d   : > { %732 = vmatprep.mubr.f32.mxu0 %v4525_v0  ;;  %845 = vmatprep.mubr.f32.mxu1 %v4525_v0 }
  0x9f   : > { %2869 = vset.pattern.permute.xlu1 %v2993_v12  ;;  %2870 = vset.pattern.permute.xlu0 %v2993_v12 }
  0xa0   : > { %1854 = vperm.xlu1 %2869, %v400_v16   ;;  %1858 = vperm.xlu0 %2870, %v401_v14  }
  0xa1   : > { %733 = vmatmul.mubr.f32.gmra.mxu0 %v3296_v48  ;;  %846 = vmatmul.mubr.f32.gmra.mxu1 %v3296_v48 }
  0xa2   : > { %738 = vmatprep.mubr.f32.mxu0 %v4525_v0  ;;  %851 = vmatprep.mubr.f32.mxu1 %v4525_v0 }
  0xa4   : > { %1862 = vperm.xlu1 %2869, %v402_v3   ;;  %2871 = vset.pattern.permute.xlu0 %v2994_v18 }
  0xa5   : > { %1889 = vperm.xlu0 %2871, %v400_v16   ;;  %739 = vmatmul.mubr.f32.gmra.mxu0 %v3313_v57 }
  0xa6   : > { %852 = vmatmul.mubr.f32.gmra.mxu1 %v3313_v57  ;;  %744 = vmatprep.mubr.f32.mxu0 %v4525_v0 }
  0xa7   : > { %857 = vmatprep.mubr.f32.mxu1 %v4525_v0 }
  0xa8   : > { %1866 = vperm.xlu1 %2869, %v3352_v15  }
  0xa9   : > { %1901 = vperm.xlu0 %2871, %v3352_v15   ;;  %745 = vmatmul.mubr.f32.gmra.mxu0 %v3330_v4 }
  0xaa   : > { %858 = vmatmul.mubr.f32.gmra.mxu1 %v3330_v4  ;;  %1093 = vmatprep.mubr.f32.mxu0 %v4525_v0 }
  0xab   : > { %1182 = vmatprep.mubr.f32.mxu1 %v4525_v0 }
  0xac   : > { %2872 = vset.pattern.permute.xlu1 %v2994_v18 }
  0xad   : > { %1893 = vperm.xlu1 %2872, %v401_v14   ;;  %2874 = vset.pattern.permute.xlu0 %v2995_v19 }
  0xae   : > { %953 = vperm.xlu0 %2874, %v401_v14  }
  0xb1   : > { %1897 = vperm.xlu1 %2872, %v402_v3  }
  0xb2   : > { %2875 = vset.pattern.permute.xlu0 %v2994_v18  ;;  %v3451_v18 = vld [vmem:[%s4518_s2 + $0x8] sm:$0xff] }
  0xb5   : > { %2873 = vset.pattern.permute.xlu1 %v2995_v19 }
  0xb6   : > { %949 = vperm.xlu1 %2873, %v400_v16  }
  0xba   : > { %957 = vperm.xlu1 %2873, %v402_v3   ;;  %v3436_v3 = vld [vmem:[%s4518_s2] sm:$0xff] }
  0xbe   : > { %961 = vperm.xlu1 %2873, %v3352_v15  }
 0x109   : > { %v3397_v30 = vpop.permute.xlu0 %881  ;;  %v3399_v33 = vpop.permute.xlu1 %871 }
 0x10d   : > { %v3401_v36 = vpop.permute.xlu0 %876  ;;  %v3411_v47 = vpop.permute.xlu1 %866 }
 0x11c   : > { %v478_v20 = vpop.f32.mrf.mxu0  ;;  %v591_v21 = vpop.f32.mrf.mxu1 }
 0x11d   : > { %v884_v62 = vadd.f32 %v3411_v47, %v478_v20  ;;  %v886_v63 = vadd.f32 %v3411_v47, %v591_v21 }
 0x11e   : > { %v480_v22 = vpop.f32.mrf.mxu0  ;;  %v593_v23 = vpop.f32.mrf.mxu1 }
 0x11f   : > { %v885_v58 = vadd.f32 %v3411_v47, %v480_v22  ;;  %v887_v59 = vadd.f32 %v3411_v47, %v593_v23  ;;  %v916_v13 = vmax.f32 %v884_v62, 0.0  ;;  %v918_v14 = vmax.f32 %v886_v63, 0.0  ;;  %v3470_v23 = vld [vmem:[%s4518_s2 + $0x10] sm:$0xff] }
 0x121   : > { %v917_v10 = vmax.f32 %v885_v58, 0.0  ;;  %v919_v11 = vmax.f32 %v887_v59, 0.0 }
 0x122   : > { %v484_v24 = vpop.f32.mrf.mxu0  ;;  %v597_v25 = vpop.f32.mrf.mxu1 }
 0x123   : > { %v892_v52 = vadd.f32 %v3399_v33, %v484_v24  ;;  %v894_v53 = vadd.f32 %v3399_v33, %v597_v25 }
 0x124   : > { %v486_v26 = vpop.f32.mrf.mxu0  ;;  %v599_v27 = vpop.f32.mrf.mxu1 }
 0x125   : > { %v893_v48 = vadd.f32 %v3399_v33, %v486_v26  ;;  %v895_v49 = vadd.f32 %v3399_v33, %v599_v27  ;;  %v924_v8 = vmax.f32 %v892_v52, 0.0  ;;  %v926_v9 = vmax.f32 %v894_v53, 0.0  ;;  %v3485_v26 = vld [vmem:[%s4518_s2 + $0x18] sm:$0xff] }
 0x127   : > { %v925_v6 = vmax.f32 %v893_v48, 0.0  ;;  %v927_v7 = vmax.f32 %v895_v49, 0.0 }
 0x128   : > { %v490_v28 = vpop.f32.mrf.mxu0  ;;  %v603_v29 = vpop.f32.mrf.mxu1 }
 0x129   : > { %v900_v45 = vadd.f32 %v3401_v36, %v490_v28  ;;  %v902_v46 = vadd.f32 %v3401_v36, %v603_v29 }
 0x12a   : > { %v492_v31 = vpop.f32.mrf.mxu0  ;;  %v605_v32 = vpop.f32.mrf.mxu1 }
 0x12b   : > { %v901_v41 = vadd.f32 %v3401_v36, %v492_v31  ;;  %v903_v42 = vadd.f32 %v3401_v36, %v605_v32  ;;  %v932_v1 = vmax.f32 %v900_v45, 0.0  ;;  %v934_v2 = vmax.f32 %v902_v46, 0.0 }
 0x12d   : > { %v933_v60 = vmax.f32 %v901_v41, 0.0  ;;  %v935_v61 = vmax.f32 %v903_v42, 0.0 }
 0x12e   : > { %v496_v34 = vpop.f32.mrf.mxu0  ;;  %v609_v35 = vpop.f32.mrf.mxu1 }
 0x12f   : > { %v908_v37 = vadd.f32 %v3397_v30, %v496_v34  ;;  %v910_v38 = vadd.f32 %v3397_v30, %v609_v35 }
 0x130   : > { %v498_v39 = vpop.f32.mrf.mxu0  ;;  %v611_v40 = vpop.f32.mrf.mxu1 }
 0x131   : > { %v909_v43 = vadd.f32 %v3397_v30, %v498_v39  ;;  %v911_v44 = vadd.f32 %v3397_v30, %v611_v40  ;;  %v940_v54 = vmax.f32 %v908_v37, 0.0  ;;  %v942_v55 = vmax.f32 %v910_v38, 0.0 }
 0x133   : > { %v941_v50 = vmax.f32 %v909_v43, 0.0  ;;  %v943_v51 = vmax.f32 %v911_v44, 0.0 }
 0x134   : > { %v3417_v56 = vpop.f32.mrf.mxu0  ;;  %v3419_v57 = vpop.f32.mrf.mxu1 }
 0x135   : > { %1053 = vmatprep.subr.mxu0 %v941_v50  ;;  %1142 = vmatprep.subr.mxu1 %v943_v51 }
 0x136   : > { %v3425_v4 = vpop.f32.mrf.mxu0  ;;  %v3427_v5 = vpop.f32.mrf.mxu1  ;;  %1054 = vmatpush1.msra.mxu0 %v940_v54  ;;  %1143 = vmatpush1.msra.mxu1 %v942_v55 }
 0x137   : > { %1055 = vmatprep.subr.mxu0 %v933_v60  ;;  %1144 = vmatprep.subr.mxu1 %v935_v61 }
 0x138   : > { %1056 = vmatpush1.msra.mxu0 %v932_v1  ;;  %1145 = vmatpush1.msra.mxu1 %v934_v2 }
 0x139   : > { %1057 = vmatprep.subr.mxu0 %v925_v6  ;;  %1146 = vmatprep.subr.mxu1 %v927_v7 }
 0x13a   : > { %v3429_v15 = vpop.f32.mrf.mxu0  ;;  %v3431_v16 = vpop.f32.mrf.mxu1  ;;  %1058 = vmatpush1.msra.mxu0 %v924_v8  ;;  %1147 = vmatpush1.msra.mxu1 %v926_v9 }
 0x13b   : > { %1059 = vmatprep.subr.mxu0 %v917_v10  ;;  %1148 = vmatprep.subr.mxu1 %v919_v11 }
 0x13c   : > { %v3438_v17 = vpop.f32.mrf.mxu0  ;;  %v3440_v12 = vpop.f32.mrf.mxu1  ;;  %1060 = vmatpush1.msra.mxu0 %v916_v13  ;;  %1149 = vmatpush1.msra.mxu1 %v918_v14 }
 0x13d   : > { %2588 = vmatmul.mubr.msk.f32.vlgmr.msra.gmra.mxu0 %vm1016_vm0, %v3436_v3  ;;  %2592 = vmatmul.mubr.msk.f32.vlgmr.msra.gmra.mxu1 %vm1016_vm0, %v3436_v3 }
 0x13e   : > { %1099 = vmatprep.mubr.f32.mxu0 %v4525_v0  ;;  %1188 = vmatprep.mubr.f32.mxu1 %v4525_v0 }
 0x140   : > { %v3453_v19 = vpop.f32.mrf.mxu0  ;;  %v3455_v20 = vpop.f32.mrf.mxu1 }
 0x141   : > { %2589 = vmatmul.mubr.msk.f32.gmra.mxu0 %vm1016_vm0, %v3451_v18  ;;  %2593 = vmatmul.mubr.msk.f32.gmra.mxu1 %vm1016_vm0, %v3451_v18 }
 0x142   : > { %v3461_v21 = vpop.f32.mrf.mxu0  ;;  %v3463_v22 = vpop.f32.mrf.mxu1  ;;  %1105 = vmatprep.mubr.f32.mxu0 %v4525_v0  ;;  %1194 = vmatprep.mubr.f32.mxu1 %v4525_v0 }
 0x145   : > { %2590 = vmatmul.mubr.msk.f32.gmra.mxu0 %vm1016_vm0, %v3470_v23  ;;  %2594 = vmatmul.mubr.msk.f32.gmra.mxu1 %vm1016_vm0, %v3470_v23 }
 0x146   : > { %v3476_v24 = vpop.f32.mrf.mxu0  ;;  %v3478_v25 = vpop.f32.mrf.mxu1  ;;  %1111 = vmatprep.mubr.f32.mxu0 %v4525_v0  ;;  %1200 = vmatprep.mubr.f32.mxu1 %v4525_v0 }
 0x147   : > { %4554 = vst [vmem:[#allocation8_spill] sm:$0xff] %v3478_v25 }
 0x148   : > { %v3487_v27 = vpop.f32.mrf.mxu0  ;;  %v3489_v28 = vpop.f32.mrf.mxu1 }
 0x149   : > { %4555 = vst [vmem:[#allocation9_spill] sm:$0xff] %v3487_v27  ;;  %4556 = vst [vmem:[#allocation10_spill] sm:$0xff] %v3489_v28  ;;  %2591 = vmatmul.mubr.msk.f32.gmra.mxu0 %vm1016_vm0, %v3485_v26  ;;  %2595 = vmatmul.mubr.msk.f32.gmra.mxu1 %vm1016_vm0, %v3485_v26 }
 0x14a   : > { %1271 = vmatprep.mubr.f32.mxu0 %v4525_v0  ;;  %1360 = vmatprep.mubr.f32.mxu1 %v4525_v0 }
 0x14c   : > { %v704_v29 = vpop.f32.mrf.mxu0  ;;  %v817_v31 = vpop.f32.mrf.mxu1 }
 0x14d   : > { %v890_v10 = vadd.f32 %v3411_v47, %v817_v31  ;;  %v1448_v31 = vld [vmem:[%s4520_s4 + $0x1f8] sm:$0xff] }
 0x14e   : > { %v706_v32 = vpop.f32.mrf.mxu0  ;;  %v819_v34 = vpop.f32.mrf.mxu1 }
 0x14f   : > { %v889_v7 = vadd.f32 %v3411_v47, %v706_v32 }
 0x150   : > { %v710_v35 = vpop.f32.mrf.mxu0  ;;  %v823_v37 = vpop.f32.mrf.mxu1 }
 0x151   : > { %v896_v63 = vadd.f32 %v3399_v33, %v710_v35  ;;  %v898_v1 = vadd.f32 %v3399_v33, %v823_v37 }
 0x152   : > { %v712_v38 = vpop.f32.mrf.mxu0  ;;  %v825_v39 = vpop.f32.mrf.mxu1 }
 0x153   : > { %v897_v59 = vadd.f32 %v3399_v33, %v712_v38  ;;  %v899_v60 = vadd.f32 %v3399_v33, %v825_v39  ;;  %v928_v35 = vmax.f32 %v896_v63, 0.0  ;;  %v930_v32 = vmax.f32 %v898_v1, 0.0  ;;  %v1400_v39 = vld [vmem:[%s4520_s4 + $0x78] sm:$0xff]  ;;  %v1426_v63 = vld [vmem:[%s4520_s4 + $0x148] sm:$0xff]  ;;  %v1409_v1 = vld [vmem:[%s4520_s4 + $0xc0] sm:$0xff] }
 0x154   : > { %v716_v40 = vpop.f32.mrf.mxu0  ;;  %v829_v41 = vpop.f32.mrf.mxu1 }
 0x155   : > { %v904_v55 = vadd.f32 %v3401_v36, %v716_v40  ;;  %v906_v58 = vadd.f32 %v3401_v36, %v829_v41  ;;  %v929_v14 = vmax.f32 %v897_v59, 0.0  ;;  %v931_v33 = vmax.f32 %v899_v60, 0.0  ;;  %v1432_v40 = vld [vmem:[%s4520_s4 + $0x178] sm:$0xff]  ;;  %v1447_v41 = vld [vmem:[%s4520_s4 + $0x1f0] sm:$0xff]  ;;  %v1410_v60 = vld [vmem:[%s4520_s4 + $0xc8] sm:$0xff] }
 0x156   : > { %v718_v42 = vpop.f32.mrf.mxu0  ;;  %v831_v43 = vpop.f32.mrf.mxu1  ;;  %v1427_v59 = vld [vmem:[%s4520_s4 + $0x150] sm:$0xff] }
 0x157   : > { %v905_v51 = vadd.f32 %v3401_v36, %v718_v42  ;;  %v907_v52 = vadd.f32 %v3401_v36, %v831_v43  ;;  %v888_v36 = vadd.f32 %v3411_v47, %v704_v29  ;;  %v936_v11 = vmax.f32 %v904_v55, 0.0  ;;  %v1399_v42 = vld [vmem:[%s4520_s4 + $0x70] sm:$0xff] }
 0x158   : > { %v722_v44 = vpop.f32.mrf.mxu0  ;;  %v835_v45 = vpop.f32.mrf.mxu1  ;;  %v938_v13 = vmax.f32 %v906_v58, 0.0  ;;  %v922_v29 = vmax.f32 %v890_v10, 0.0  ;;  %v1431_v43 = vld [vmem:[%s4520_s4 + $0x170] sm:$0xff] }
 0x159   : > { %v912_v46 = vadd.f32 %v3397_v30, %v722_v44  ;;  %v914_v48 = vadd.f32 %v3397_v30, %v835_v45  ;;  %v937_v8 = vmax.f32 %v905_v51, 0.0  ;;  %v939_v9 = vmax.f32 %v907_v52, 0.0  ;;  %v1446_v44 = vld [vmem:[%s4520_s4 + $0x1e8] sm:$0xff]  ;;  %v1412_v51 = vld [vmem:[%s4520_s4 + $0xd8] sm:$0xff]  ;;  %v1443_v55 = vld [vmem:[%s4520_s4 + $0x1d0] sm:$0xff] }
 0x15a   : > { %v724_v49 = vpop.f32.mrf.mxu0  ;;  %v837_v50 = vpop.f32.mrf.mxu1  ;;  %v920_v38 = vmax.f32 %v888_v36, 0.0  ;;  %v1398_v45 = vld [vmem:[%s4520_s4 + $0x68] sm:$0xff]  ;;  %v1444_v52 = vld [vmem:[%s4520_s4 + $0x1d8] sm:$0xff]  ;;  %v1395_v58 = vld [vmem:[%s4520_s4 + $0x50] sm:$0xff] }
 0x15b   : > { %v913_v53 = vadd.f32 %v3397_v30, %v724_v49  ;;  %v915_v54 = vadd.f32 %v3397_v30, %v837_v50  ;;  %v944_v2 = vmax.f32 %v912_v46, 0.0  ;;  %v946_v6 = vmax.f32 %v914_v48, 0.0  ;;  %v1430_v46 = vld [vmem:[%s4520_s4 + $0x168] sm:$0xff]  ;;  %v1413_v48 = vld [vmem:[%s4520_s4 + $0xe0] sm:$0xff]  ;;  %v1424_v36 = vld [vmem:[%s4520_s4 + $0x138] sm:$0xff] }
 0x15c   : > { %v891_v30 = vadd.f32 %v3411_v47, %v819_v34  ;;  %v921_v34 = vmax.f32 %v889_v7, 0.0  ;;  %v1416_v47 = vld [vmem:[%s4520_s4 + $0xf8] sm:$0xff]  ;;  %v1397_v49 = vld [vmem:[%s4520_s4 + $0x60] sm:$0xff]  ;;  %v1407_v10 = vld [vmem:[%s4520_s4 + $0xb0] sm:$0xff] }
 0x15d   : > { %v945_v61 = vmax.f32 %v913_v53, 0.0  ;;  %v947_v62 = vmax.f32 %v915_v54, 0.0  ;;  %v1429_v50 = vld [vmem:[%s4520_s4 + $0x160] sm:$0xff]  ;;  %v1396_v53 = vld [vmem:[%s4520_s4 + $0x58] sm:$0xff] }
 0x15e   : > { %v923_v37 = vmax.f32 %v891_v30, 0.0  ;;  %v1428_v54 = vld [vmem:[%s4520_s4 + $0x158] sm:$0xff]  ;;  %v1425_v7 = vld [vmem:[%s4520_s4 + $0x140] sm:$0xff] }
 0x15f   : > { %1231 = vmatprep.subr.mxu0 %v945_v61  ;;  %1320 = vmatprep.subr.mxu1 %v947_v62  ;;  %v1442_v61 = vld [vmem:[%s4520_s4 + $0x1c8] sm:$0xff]  ;;  %v1408_v30 = vld [vmem:[%s4520_s4 + $0xb8] sm:$0xff] }
 0x160   : > { %1232 = vmatpush1.msra.mxu0 %v944_v2  ;;  %1321 = vmatpush1.msra.mxu1 %v946_v6  ;;  %v1394_v62 = vld [vmem:[%s4520_s4 + $0x48] sm:$0xff]  ;;  %v1441_v2 = vld [vmem:[%s4520_s4 + $0x1c0] sm:$0xff] }
 0x161   : > { %1233 = vmatprep.subr.mxu0 %v937_v8  ;;  %1322 = vmatprep.subr.mxu1 %v939_v9  ;;  %v1393_v6 = vld [vmem:[%s4520_s4 + $0x40] sm:$0xff]  ;;  %v1440_v8 = vld [vmem:[%s4520_s4 + $0x1b8] sm:$0xff] }
 0x162   : > { %1234 = vmatpush1.msra.mxu0 %v936_v11  ;;  %1323 = vmatpush1.msra.mxu1 %v938_v13  ;;  %v1392_v9 = vld [vmem:[%s4520_s4 + $0x38] sm:$0xff]  ;;  %v1439_v11 = vld [vmem:[%s4520_s4 + $0x1b0] sm:$0xff] }
 0x163   : > { %1235 = vmatprep.subr.mxu0 %v929_v14  ;;  %1324 = vmatprep.subr.mxu1 %v931_v33  ;;  %v1391_v13 = vld [vmem:[%s4520_s4 + $0x30] sm:$0xff]  ;;  %v1406_v33 = vld [vmem:[%s4520_s4 + $0xa8] sm:$0xff] }
 0x164   : > { %1236 = vmatpush1.msra.mxu0 %v928_v35  ;;  %1325 = vmatpush1.msra.mxu1 %v930_v32  ;;  %v1423_v14 = vld [vmem:[%s4520_s4 + $0x130] sm:$0xff]  ;;  %v1438_v35 = vld [vmem:[%s4520_s4 + $0x1a8] sm:$0xff] }
 0x165   : > { %1237 = vmatprep.subr.mxu0 %v921_v34  ;;  %1326 = vmatprep.subr.mxu1 %v923_v37  ;;  %v1390_v32 = vld [vmem:[%s4520_s4 + $0x28] sm:$0xff]  ;;  %v1405_v37 = vld [vmem:[%s4520_s4 + $0xa0] sm:$0xff] }
 0x166   : > { %1238 = vmatpush1.msra.mxu0 %v920_v38  ;;  %1327 = vmatpush1.msra.mxu1 %v922_v29  ;;  %v1422_v34 = vld [vmem:[%s4520_s4 + $0x128] sm:$0xff]  ;;  %v1437_v38 = vld [vmem:[%s4520_s4 + $0x1a0] sm:$0xff] }
 0x167   : > { %2596 = vmatmul.mubr.msk.f32.vlgmr.msra.gmra.mxu0 %vm1016_vm0, %v3436_v3  ;;  %2600 = vmatmul.mubr.msk.f32.vlgmr.msra.gmra.mxu1 %vm1016_vm0, %v3436_v3  ;;  %v1415_v3 = vld [vmem:[%s4520_s4 + $0xf0] sm:$0xff]  ;;  %v1389_v29 = vld [vmem:[%s4520_s4 + $0x20] sm:$0xff] }
 0x168   : > { %1277 = vmatprep.mubr.f32.mxu0 %v4525_v0  ;;  %1366 = vmatprep.mubr.f32.mxu1 %v4525_v0 }
 0x169   : > { %2631 = vmatprep.subr.mxu0 %v1416_v47  ;;  %2675 = vmatprep.subr.mxu1 %v1448_v31  ;;  %v1421_v47 = vld [vmem:[%s4520_s4 + $0x120] sm:$0xff]  ;;  %v1404_v31 = vld [vmem:[%s4520_s4 + $0x98] sm:$0xff] }
 0x16a   : > { %2632 = vmatpush3.msra.mxu0 %v1400_v39  ;;  %2676 = vmatpush3.msra.mxu1 %v1432_v40  ;;  %v1436_v39 = vld [vmem:[%s4520_s4 + $0x198] sm:$0xff] }
 0x16b   : > { %2597 = vmatmul.mubr.msk.f32.gmra.mxu0 %vm1016_vm0, %v3451_v18  ;;  %2601 = vmatmul.mubr.msk.f32.gmra.mxu1 %vm1016_vm0, %v3451_v18  ;;  %v1414_v18 = vld [vmem:[%s4520_s4 + $0xe8] sm:$0xff]  ;;  %v1388_v40 = vld [vmem:[%s4520_s4 + $0x18] sm:$0xff] }
 0x16c   : > { %1283 = vmatprep.mubr.f32.mxu0 %v4525_v0  ;;  %1372 = vmatprep.mubr.f32.mxu1 %v4525_v0 }
 0x16d   : > { %2633 = vmatprep.subr.mxu0 %v1415_v3  ;;  %2677 = vmatprep.subr.mxu1 %v1447_v41  ;;  %v1420_v3 = vld [vmem:[%s4520_s4 + $0x118] sm:$0xff]  ;;  %v1403_v41 = vld [vmem:[%s4520_s4 + $0x90] sm:$0xff] }
 0x16e   : > { %2634 = vmatpush3.msra.mxu0 %v1399_v42  ;;  %2678 = vmatpush3.msra.mxu1 %v1431_v43  ;;  %v1435_v42 = vld [vmem:[%s4520_s4 + $0x190] sm:$0xff] }
 0x16f   : > { %2598 = vmatmul.mubr.msk.f32.gmra.mxu0 %vm1016_vm0, %v3470_v23  ;;  %2602 = vmatmul.mubr.msk.f32.gmra.mxu1 %vm1016_vm0, %v3470_v23  ;;  %v1445_v23 = vld [vmem:[%s4520_s4 + $0x1e0] sm:$0xff]  ;;  %v1387_v43 = vld [vmem:[%s4520_s4 + $0x10] sm:$0xff] }
 0x170   : > { %1289 = vmatprep.mubr.f32.mxu0 %v4525_v0  ;;  %1378 = vmatprep.mubr.f32.mxu1 %v4525_v0 }
 0x171   : > { %2635 = vmatprep.subr.mxu0 %v1414_v18  ;;  %2679 = vmatprep.subr.mxu1 %v1446_v44  ;;  %v1419_v18 = vld [vmem:[%s4520_s4 + $0x110] sm:$0xff]  ;;  %v1402_v44 = vld [vmem:[%s4520_s4 + $0x88] sm:$0xff] }
 0x172   : > { %2636 = vmatpush3.msra.mxu0 %v1398_v45  ;;  %2680 = vmatpush3.msra.mxu1 %v1430_v46  ;;  %v1434_v45 = vld [vmem:[%s4520_s4 + $0x188] sm:$0xff] }
 0x173   : > { %2599 = vmatmul.mubr.msk.f32.gmra.mxu0 %vm1016_vm0, %v3485_v26  ;;  %2603 = vmatmul.mubr.msk.f32.gmra.mxu1 %vm1016_vm0, %v3485_v26  ;;  %v1411_v26 = vld [vmem:[%s4520_s4 + $0xd0] sm:$0xff]  ;;  %v1386_v46 = vld [vmem:[%s4520_s4 + $0x8] sm:$0xff] }
 0x174   : > { %2637 = vmatprep.subr.mxu0 %v1413_v48  ;;  %2681 = vmatprep.subr.mxu1 %v1445_v23  ;;  %v1418_v48 = vld [vmem:[%s4520_s4 + $0x108] sm:$0xff]  ;;  %v1401_v23 = vld [vmem:[%s4520_s4 + $0x80] sm:$0xff] }
 0x175   : > { %2638 = vmatpush3.msra.mxu0 %v1397_v49  ;;  %2682 = vmatpush3.msra.mxu1 %v1429_v50  ;;  %v1433_v49 = vld [vmem:[%s4520_s4 + $0x180] sm:$0xff] }
 0x176   : > { %2639 = vmatprep.subr.mxu0 %v1412_v51  ;;  %2683 = vmatprep.subr.mxu1 %v1444_v52  ;;  %v1385_v50 = vld [vmem:[%s4520_s4] sm:$0xff]  ;;  %v1480_v52 = vld [vmem:[%s4520_s4 + $0x2f8] sm:$0xff] }
 0x177   : > { %2640 = vmatpush3.msra.mxu0 %v1396_v53  ;;  %2684 = vmatpush3.msra.mxu1 %v1428_v54  ;;  %v1417_v51 = vld [vmem:[%s4520_s4 + $0x100] sm:$0xff]  ;;  %v1512_v53 = vld [vmem:[%s4520_s4 + $0x3f8] sm:$0xff]  ;;  %v3733_v54 = vpop.f32.mrf.mxu0 }
 0x178   : > { %2641 = vmatprep.subr.mxu0 %v1411_v26  ;;  %2685 = vmatprep.subr.mxu1 %v1443_v55  ;;  %4557 = vst [vmem:[#allocation11_spill] sm:$0xff] %v3733_v54  ;;  %v3735_v26 = vpop.f32.mrf.mxu1 }
 0x179   : > { %2642 = vmatpush3.msra.mxu0 %v1395_v58  ;;  %2686 = vmatpush3.msra.mxu1 %v1427_v59  ;;  %4558 = vst [vmem:[#allocation12_spill] sm:$0xff] %v3735_v26  ;;  %v3737_v55 = vpop.f32.mrf.mxu0 }
 0x17a   : > { %2643 = vmatprep.subr.mxu0 %v1410_v60  ;;  %2687 = vmatprep.subr.mxu1 %v1442_v61  ;;  %4559 = vst [vmem:[#allocation13_spill] sm:$0xff] %v3737_v55  ;;  %v3739_v58 = vpop.f32.mrf.mxu1 }
 0x17b   : > { %2644 = vmatpush3.msra.mxu0 %v1394_v62  ;;  %2688 = vmatpush3.msra.mxu1 %v1426_v63  ;;  %4560 = vst [vmem:[#allocation14_spill] sm:$0xff] %v3739_v58  ;;  %v3741_v59 = vpop.f32.mrf.mxu0 }
 0x17c   : > { %2645 = vmatprep.subr.mxu0 %v1409_v1  ;;  %2689 = vmatprep.subr.mxu1 %v1441_v2  ;;  %4561 = vst [vmem:[#allocation15_spill] sm:$0xff] %v3741_v59  ;;  %v3743_v60 = vpop.f32.mrf.mxu1 }
 0x17d   : > { %2646 = vmatpush3.msra.mxu0 %v1393_v6  ;;  %2690 = vmatpush3.msra.mxu1 %v1425_v7  ;;  %4562 = vst [vmem:[#allocation16_spill] sm:$0xff] %v3743_v60  ;;  %v3745_v61 = vpop.f32.mrf.mxu0 }
 0x17e   : > { %2647 = vmatprep.subr.mxu0 %v1408_v30  ;;  %2691 = vmatprep.subr.mxu1 %v1440_v8  ;;  %4563 = vst [vmem:[#allocation17_spill] sm:$0xff] %v3745_v61  ;;  %v3747_v62 = vpop.f32.mrf.mxu1 }
 0x17f   : > { %2648 = vmatpush3.msra.mxu0 %v1392_v9  ;;  %2692 = vmatpush3.msra.mxu1 %v1424_v36  ;;  %4564 = vst [vmem:[#allocation18_spill] sm:$0xff] %v3747_v62  ;;  %v3749_v63 = vpop.f32.mrf.mxu0 }
 0x180   : > { %2649 = vmatprep.subr.mxu0 %v1407_v10  ;;  %2693 = vmatprep.subr.mxu1 %v1439_v11  ;;  %4565 = vst [vmem:[#allocation19_spill] sm:$0xff] %v3749_v63  ;;  %v3751_v1 = vpop.f32.mrf.mxu1  ;;  %v3765_v11 = vpop.permute.xlu0 %1001 }
 0x181   : > { %2650 = vmatpush3.msra.mxu0 %v1391_v13  ;;  %2694 = vmatpush3.msra.mxu1 %v1423_v14  ;;  %4566 = vst [vmem:[#allocation20_spill] sm:$0xff] %v3751_v1  ;;  %v3753_v2 = vpop.f32.mrf.mxu0 }
 0x182   : > { %2651 = vmatprep.subr.mxu0 %v1406_v33  ;;  %2695 = vmatprep.subr.mxu1 %v1438_v35  ;;  %4567 = vst [vmem:[#allocation21_spill] sm:$0xff] %v3753_v2  ;;  %v3755_v6 = vpop.f32.mrf.mxu1 }
 0x183   : > { %2652 = vmatpush3.msra.mxu0 %v1390_v32  ;;  %2696 = vmatpush3.msra.mxu1 %v1422_v34  ;;  %4568 = vst [vmem:[#allocation22_spill] sm:$0xff] %v3755_v6  ;;  %v3757_v7 = vpop.f32.mrf.mxu0 }
 0x184   : > { %2653 = vmatprep.subr.mxu0 %v1405_v37  ;;  %2697 = vmatprep.subr.mxu1 %v1437_v38  ;;  %4569 = vst [vmem:[#allocation23_spill] sm:$0xff] %v3757_v7  ;;  %v3759_v30 = vpop.f32.mrf.mxu1  ;;  %v1464_v37 = vld [vmem:[%s4520_s4 + $0x278] sm:$0xff] }
 0x185   : > { %2654 = vmatpush3.msra.mxu0 %v1389_v29  ;;  %2698 = vmatpush3.msra.mxu1 %v1421_v47  ;;  %4570 = vst [vmem:[#allocation24_spill] sm:$0xff] %v3759_v30  ;;  %v3761_v8 = vpop.f32.mrf.mxu0  ;;  %v1496_v38 = vld [vmem:[%s4520_s4 + $0x378] sm:$0xff] }
 0x186   : > { %2655 = vmatprep.subr.mxu0 %v1404_v31  ;;  %2699 = vmatprep.subr.mxu1 %v1436_v39  ;;  %4571 = vst [vmem:[#allocation25_spill] sm:$0xff] %v3761_v8  ;;  %v3763_v9 = vpop.f32.mrf.mxu1  ;;  %v1479_v31 = vld [vmem:[%s4520_s4 + $0x2f0] sm:$0xff] }
 0x187   : > { %2656 = vmatpush3.msra.mxu0 %v1388_v40  ;;  %2700 = vmatpush3.msra.mxu1 %v1420_v3  ;;  %4572 = vst [vmem:[#allocation26_spill] sm:$0xff] %v3763_v9  ;;  %v1511_v39 = vld [vmem:[%s4520_s4 + $0x3f0] sm:$0xff] }
 0x188   : > { %2657 = vmatprep.subr.mxu0 %v1403_v41  ;;  %2701 = vmatprep.subr.mxu1 %v1435_v42  ;;  %v1463_v40 = vld [vmem:[%s4520_s4 + $0x270] sm:$0xff]  ;;  %v1478_v41 = vld [vmem:[%s4520_s4 + $0x2e8] sm:$0xff] }
 0x189   : > { %2658 = vmatpush3.msra.mxu0 %v1387_v43  ;;  %2702 = vmatpush3.msra.mxu1 %v1419_v18  ;;  %v1495_v3 = vld [vmem:[%s4520_s4 + $0x370] sm:$0xff]  ;;  %v1510_v42 = vld [vmem:[%s4520_s4 + $0x3e8] sm:$0xff] }
 0x18a   : > { %2659 = vmatprep.subr.mxu0 %v1402_v44  ;;  %2703 = vmatprep.subr.mxu1 %v1434_v45  ;;  %v1462_v43 = vld [vmem:[%s4520_s4 + $0x268] sm:$0xff] }
 0x18b   : > { %2660 = vmatpush3.msra.mxu0 %v1386_v46  ;;  %2704 = vmatpush3.msra.mxu1 %v1418_v48  ;;  %v1494_v18 = vld [vmem:[%s4520_s4 + $0x368] sm:$0xff]  ;;  %v1477_v46 = vld [vmem:[%s4520_s4 + $0x2e0] sm:$0xff] }
 0x18c   : > { %2661 = vmatprep.subr.mxu0 %v1401_v23  ;;  %2705 = vmatprep.subr.mxu1 %v1433_v49  ;;  %v1509_v48 = vld [vmem:[%s4520_s4 + $0x3e0] sm:$0xff] }
 0x18d   : > { %2662 = vmatpush3.msra.mxu0 %v1385_v50  ;;  %2706 = vmatpush3.msra.mxu1 %v1417_v51  ;;  %v1461_v23 = vld [vmem:[%s4520_s4 + $0x260] sm:$0xff]  ;;  %v1476_v50 = vld [vmem:[%s4520_s4 + $0x2d8] sm:$0xff] }
 0x18e   : > { %2719 = vmatprep.subr.mxu0 %v1480_v52  ;;  %2763 = vmatprep.subr.mxu1 %v1512_v53  ;;  %v1493_v49 = vld [vmem:[%s4520_s4 + $0x360] sm:$0xff]  ;;  %v1508_v51 = vld [vmem:[%s4520_s4 + $0x3d8] sm:$0xff] }
 0x18f   : > { %v1460_v52 = vld [vmem:[%s4520_s4 + $0x258] sm:$0xff] }
 0x190   : > { %v1492_v53 = vld [vmem:[%s4520_s4 + $0x358] sm:$0xff] }
 0x1fd   : > { %v1095_v36 = vpop.f32.mrf.mxu0  ;;  %v1184_v10 = vpop.f32.mrf.mxu1 }
 0x1fe   : > { %v3768_v13 = vadd.f32 %v1184_v10, %v3765_v11  ;;  %v3777_v34 = vadd.f32 %v1095_v36, %v3765_v11 }
 0x1ff   : > { %v1097_v14 = vpop.f32.mrf.mxu0  ;;  %v1186_v33 = vpop.f32.mrf.mxu1 }
 0x200   : > { %v3771_v35 = vadd.f32 %v1097_v14, %v3765_v11  ;;  %v3774_v32 = vadd.f32 %v1186_v33, %v3765_v11  ;;  %v3837_v14 = vpop.permute.xlu1 %1005  ;;  %v1475_v33 = vld [vmem:[%s4520_s4 + $0x2d0] sm:$0xff] }
 0x201   : > { %v1101_v29 = vpop.f32.mrf.mxu0  ;;  %v1190_v47 = vpop.f32.mrf.mxu1 }
 0x202   : > { %1577 = vmatprep.mubr.f32.mxu0 %v3771_v35  ;;  %1662 = vmatprep.mubr.f32.mxu1 %v3774_v32 }
 0x203   : > { %1578 = vmatmul.mubr.f32.vlgmr.msra.gmra.mxu0 %v3777_v34  ;;  %1663 = vmatmul.mubr.f32.vlgmr.msra.gmra.mxu1 %v3768_v13  ;;  %v1103_v44 = vpop.f32.mrf.mxu0  ;;  %v1192_v45 = vpop.f32.mrf.mxu1 }
 0x204   : > { %2720 = vmatpush3.msra.mxu0 %v1464_v37  ;;  %2764 = vmatpush3.msra.mxu1 %v1496_v38  ;;  %v1507_v37 = vld [vmem:[%s4520_s4 + $0x3d0] sm:$0xff] }
 0x205   : > { %2721 = vmatprep.subr.mxu0 %v1479_v31  ;;  %2765 = vmatprep.subr.mxu1 %v1511_v39  ;;  %v1107_v36 = vpop.f32.mrf.mxu0  ;;  %v1196_v10 = vpop.f32.mrf.mxu1  ;;  %v1459_v38 = vld [vmem:[%s4520_s4 + $0x250] sm:$0xff]  ;;  %v3852_v39 = vadd.f32 %v1103_v44, %v3837_v14  ;;  %v3867_v44 = vadd.f32 %v1190_v47, %v3837_v14  ;;  %v1505_v47 = vld [vmem:[%s4520_s4 + $0x3c0] sm:$0xff] }
 0x206   : > { %2722 = vmatpush3.msra.mxu0 %v1463_v40  ;;  %2766 = vmatpush3.msra.mxu1 %v1495_v3  ;;  %v1491_v31 = vld [vmem:[%s4520_s4 + $0x350] sm:$0xff]  ;;  %v3855_v40 = vadd.f32 %v1192_v45, %v3837_v14  ;;  %v1474_v3 = vld [vmem:[%s4520_s4 + $0x2c8] sm:$0xff] }
 0x207   : > { %2723 = vmatprep.subr.mxu0 %v1478_v41  ;;  %2767 = vmatprep.subr.mxu1 %v1510_v42  ;;  %v1506_v41 = vld [vmem:[%s4520_s4 + $0x3c8] sm:$0xff]  ;;  %v1109_v42 = vpop.f32.mrf.mxu0 }
 0x208   : > { %2724 = vmatpush3.msra.mxu0 %v1462_v43  ;;  %2768 = vmatpush3.msra.mxu1 %v1494_v18  ;;  %v1198_v43 = vpop.f32.mrf.mxu1  ;;  %v3864_v18 = vadd.f32 %v1101_v29, %v3837_v14  ;;  %v1458_v45 = vld [vmem:[%s4520_s4 + $0x248] sm:$0xff]  ;;  %v1473_v29 = vld [vmem:[%s4520_s4 + $0x2c0] sm:$0xff] }
 0x209   : > { %2725 = vmatprep.subr.mxu0 %v1477_v46  ;;  %2769 = vmatprep.subr.mxu1 %v1509_v48  ;;  %v1490_v46 = vld [vmem:[%s4520_s4 + $0x348] sm:$0xff]  ;;  %v3875_v48 = vpop.permute.xlu1 %1009 }
 0x20a   : > { %2726 = vmatpush3.msra.mxu0 %v1461_v23  ;;  %2770 = vmatpush3.msra.mxu1 %v1493_v49  ;;  %v1457_v23 = vld [vmem:[%s4520_s4 + $0x240] sm:$0xff] }
 0x20b   : > { %2727 = vmatprep.subr.mxu0 %v1476_v50  ;;  %2771 = vmatprep.subr.mxu1 %v1508_v51  ;;  %v1489_v49 = vld [vmem:[%s4520_s4 + $0x340] sm:$0xff]  ;;  %v1113_v50 = vpop.f32.mrf.mxu0  ;;  %v1202_v51 = vpop.f32.mrf.mxu1 }
 0x20c   : > { %2728 = vmatpush3.msra.mxu0 %v1460_v52  ;;  %2772 = vmatpush3.msra.mxu1 %v1492_v53  ;;  %v3892_v52 = vadd.f32 %v1109_v42, %v3875_v48  ;;  %v3895_v53 = vadd.f32 %v1198_v43, %v3875_v48 }
 0x20d   : > { %2729 = vmatprep.subr.mxu0 %v1475_v33  ;;  %2773 = vmatprep.subr.mxu1 %v1507_v37  ;;  %v1472_v33 = vld [vmem:[%s4520_s4 + $0x2b8] sm:$0xff]  ;;  %v1115_v42 = vpop.f32.mrf.mxu0  ;;  %v1204_v43 = vpop.f32.mrf.mxu1 }
 0x20e   : > { %2730 = vmatpush3.msra.mxu0 %v1459_v38  ;;  %2774 = vmatpush3.msra.mxu1 %v1491_v31  ;;  %v1504_v37 = vld [vmem:[%s4520_s4 + $0x3b8] sm:$0xff]  ;;  %v3906_v38 = vadd.f32 %v1107_v36, %v3875_v48  ;;  %v3909_v31 = vadd.f32 %v1196_v10, %v3875_v48  ;;  %v1471_v36 = vld [vmem:[%s4520_s4 + $0x2b0] sm:$0xff] }
 0x20f   : > { %2731 = vmatprep.subr.mxu0 %v1474_v3  ;;  %2775 = vmatprep.subr.mxu1 %v1506_v41  ;;  %v1456_v3 = vld [vmem:[%s4520_s4 + $0x238] sm:$0xff]  ;;  %v1503_v10 = vld [vmem:[%s4520_s4 + $0x3b0] sm:$0xff] }
 0x210   : > { %1582 = vmatprep.mubr.f32.mxu0 %v3852_v39  ;;  %1667 = vmatprep.mubr.f32.mxu1 %v3855_v40  ;;  %v1488_v41 = vld [vmem:[%s4520_s4 + $0x338] sm:$0xff] }
 0x211   : > { %2732 = vmatpush3.msra.mxu0 %v1458_v45  ;;  %2776 = vmatpush3.msra.mxu1 %v1490_v46  ;;  %v3925_v45 = vpop.permute.xlu0 %1013  ;;  %v1455_v46 = vld [vmem:[%s4520_s4 + $0x230] sm:$0xff] }
 0x212   : > { %1583 = vmatmul.mubr.f32.gmra.mxu0 %v3864_v18  ;;  %1668 = vmatmul.mubr.f32.gmra.mxu1 %v3867_v44 }
 0x213   : > { %2733 = vmatprep.subr.mxu0 %v1473_v29  ;;  %2777 = vmatprep.subr.mxu1 %v1505_v47  ;;  %v1487_v29 = vld [vmem:[%s4520_s4 + $0x330] sm:$0xff]  ;;  %v3934_v47 = vadd.f32 %v1115_v42, %v3925_v45  ;;  %v3957_v42 = vadd.f32 %v1202_v51, %v3925_v45  ;;  %v1485_v51 = vld [vmem:[%s4520_s4 + $0x320] sm:$0xff] }
 0x214   : > { %2734 = vmatpush3.msra.mxu0 %v1457_v23  ;;  %2778 = vmatpush3.msra.mxu1 %v1489_v49  ;;  %v3937_v23 = vadd.f32 %v1204_v43, %v3925_v45  ;;  %v1470_v49 = vld [vmem:[%s4520_s4 + $0x2a8] sm:$0xff]  ;;  %v1469_v43 = vld [vmem:[%s4520_s4 + $0x2a0] sm:$0xff] }
 0x215   : > { %2735 = vmatprep.subr.mxu0 %v1472_v33  ;;  %2779 = vmatprep.subr.mxu1 %v1504_v37  ;;  %4573 = vst [vmem:[#allocation27_spill] sm:$0xff] %v3934_v47  ;;  %v1502_v33 = vld [vmem:[%s4520_s4 + $0x3a8] sm:$0xff]  ;;  %4576 = vst [vmem:[#allocation30_spill] sm:$0xff] %v3957_v42 }
 0x216   : > { %1587 = vmatprep.mubr.f32.mxu0 %v3892_v52  ;;  %1672 = vmatprep.mubr.f32.mxu1 %v3895_v53  ;;  %4574 = vst [vmem:[#allocation28_spill] sm:$0xff] %v3937_v23  ;;  %v1454_v37 = vld [vmem:[%s4520_s4 + $0x228] sm:$0xff] }
 0x217   : > { %2736 = vmatpush3.msra.mxu0 %v1456_v3  ;;  %2780 = vmatpush3.msra.mxu1 %v1488_v41  ;;  %v1486_v3 = vld [vmem:[%s4520_s4 + $0x328] sm:$0xff]  ;;  %v3954_v41 = vadd.f32 %v1113_v50, %v3925_v45  ;;  %v1453_v50 = vld [vmem:[%s4520_s4 + $0x220] sm:$0xff] }
 0x218   : > { %1588 = vmatmul.mubr.f32.gmra.mxu0 %v3906_v38  ;;  %1673 = vmatmul.mubr.f32.gmra.mxu1 %v3909_v31 }
 0x219   : > { %2737 = vmatprep.subr.mxu0 %v1471_v36  ;;  %2781 = vmatprep.subr.mxu1 %v1503_v10  ;;  %4575 = vst [vmem:[#allocation29_spill] sm:$0xff] %v3954_v41  ;;  %v1501_v36 = vld [vmem:[%s4520_s4 + $0x3a0] sm:$0xff]  ;;  %v1468_v10 = vld [vmem:[%s4520_s4 + $0x298] sm:$0xff] }
 0x21a   : > { %2738 = vmatpush3.msra.mxu0 %v1455_v46  ;;  %2782 = vmatpush3.msra.mxu1 %v1487_v29  ;;  %v1500_v46 = vld [vmem:[%s4520_s4 + $0x398] sm:$0xff] }
 0x21b   : > { %2739 = vmatprep.subr.mxu0 %v1470_v49  ;;  %2783 = vmatprep.subr.mxu1 %v1502_v33  ;;  %v1452_v29 = vld [vmem:[%s4520_s4 + $0x218] sm:$0xff]  ;;  %v1467_v33 = vld [vmem:[%s4520_s4 + $0x290] sm:$0xff] }
 0x21c   : > { %1592 = vmatprep.mubr.f32.mxu0 %v3934_v47  ;;  %1677 = vmatprep.mubr.f32.mxu1 %v3937_v23  ;;  %v1484_v49 = vld [vmem:[%s4520_s4 + $0x318] sm:$0xff]  ;;  %v1855_v47 = vpop.permute.xlu1 %1854 }
 0x21d   : > { %2740 = vmatpush3.msra.mxu0 %v1454_v37  ;;  %2784 = vmatpush3.msra.mxu1 %v1486_v3  ;;  %v1499_v37 = vld [vmem:[%s4520_s4 + $0x390] sm:$0xff] }
 0x21e   : > { %1593 = vmatmul.mubr.f32.gmra.mxu0 %v3954_v41  ;;  %1678 = vmatmul.mubr.f32.gmra.mxu1 %v3957_v42  ;;  %v1451_v3 = vld [vmem:[%s4520_s4 + $0x210] sm:$0xff] }
 0x21f   : > { %2741 = vmatprep.subr.mxu0 %v1469_v43  ;;  %2785 = vmatprep.subr.mxu1 %v1501_v36  ;;  %v1483_v43 = vld [vmem:[%s4520_s4 + $0x310] sm:$0xff]  ;;  %v1466_v36 = vld [vmem:[%s4520_s4 + $0x288] sm:$0xff] }
 0x220   : > { %2742 = vmatpush3.msra.mxu0 %v1453_v50  ;;  %2786 = vmatpush3.msra.mxu1 %v1485_v51  ;;  %v1498_v50 = vld [vmem:[%s4520_s4 + $0x388] sm:$0xff] }
 0x221   : > { %2743 = vmatprep.subr.mxu0 %v1468_v10  ;;  %2787 = vmatprep.subr.mxu1 %v1500_v46  ;;  %v1450_v51 = vld [vmem:[%s4520_s4 + $0x208] sm:$0xff]  ;;  %v1465_v46 = vld [vmem:[%s4520_s4 + $0x280] sm:$0xff] }
 0x222   : > { %2744 = vmatpush3.msra.mxu0 %v1452_v29  ;;  %2788 = vmatpush3.msra.mxu1 %v1484_v49  ;;  %v1482_v10 = vld [vmem:[%s4520_s4 + $0x308] sm:$0xff]  ;;  %v1497_v29 = vld [vmem:[%s4520_s4 + $0x380] sm:$0xff] }
 0x223   : > { %2745 = vmatprep.subr.mxu0 %v1467_v33  ;;  %2789 = vmatprep.subr.mxu1 %v1499_v37  ;;  %v1449_v49 = vld [vmem:[%s4520_s4 + $0x200] sm:$0xff] }
 0x224   : > { %2746 = vmatpush3.msra.mxu0 %v1451_v3  ;;  %2790 = vmatpush3.msra.mxu1 %v1483_v43  ;;  %v1481_v33 = vld [vmem:[%s4520_s4 + $0x300] sm:$0xff] }
 0x225   : > { %2747 = vmatprep.subr.mxu0 %v1466_v36  ;;  %2791 = vmatprep.subr.mxu1 %v1498_v50 }
 0x226   : > { %2748 = vmatpush3.msra.mxu0 %v1450_v51  ;;  %2792 = vmatpush3.msra.mxu1 %v1482_v10 }
 0x227   : > { %v1273_v37 = vpop.f32.mrf.mxu0  ;;  %v1362_v3 = vpop.f32.mrf.mxu1  ;;  %2749 = vmatprep.subr.mxu0 %v1465_v46  ;;  %2793 = vmatprep.subr.mxu1 %v1497_v29 }
 0x228   : > { %2750 = vmatpush3.msra.mxu0 %v1449_v49  ;;  %2794 = vmatpush3.msra.mxu1 %v1481_v33  ;;  %v4030_v9 = vadd.f32 %v1273_v37, %v3765_v11  ;;  %v4033_v51 = vadd.f32 %v1362_v3, %v3765_v11 }
 0x229   : > { %v1275_v43 = vpop.f32.mrf.mxu0  ;;  %v1364_v0 = vpop.f32.mrf.mxu1 }
 0x22a   : > { %v4024_v36 = vadd.f32 %v1275_v43, %v3765_v11  ;;  %v4027_v50 = vadd.f32 %v1364_v0, %v3765_v11  ;;  %4579 = vst [vmem:[#allocation33_spill] sm:$0xff] %v4030_v9  ;;  %4580 = vst [vmem:[#allocation34_spill] sm:$0xff] %v4033_v51 }
 0x22b   : > { %v1279_v10 = vpop.f32.mrf.mxu0  ;;  %v1368_v8 = vpop.f32.mrf.mxu1 }
 0x22c   : > { %4577 = vst [vmem:[#allocation31_spill] sm:$0xff] %v4024_v36  ;;  %4578 = vst [vmem:[#allocation32_spill] sm:$0xff] %v4027_v50  ;;  %1747 = vmatprep.mubr.f32.mxu0 %v4024_v36  ;;  %1832 = vmatprep.mubr.f32.mxu1 %v4027_v50  ;;  %v4046_v11 = vadd.f32 %v1279_v10, %v3837_v14  ;;  %v4049_v33 = vadd.f32 %v1368_v8, %v3837_v14 }
 0x22d   : > { %v1281_v46 = vpop.f32.mrf.mxu0  ;;  %v1370_v29 = vpop.f32.mrf.mxu1  ;;  %1748 = vmatmul.mubr.f32.vlgmr.msra.gmra.mxu0 %v4030_v9  ;;  %1833 = vmatmul.mubr.f32.vlgmr.msra.gmra.mxu1 %v4033_v51 }
 0x22e   : > { %v4040_v0 = vadd.f32 %v1281_v46, %v3837_v14  ;;  %v4043_v49 = vadd.f32 %v1370_v29, %v3837_v14  ;;  %4583 = vst [vmem:[#allocation37_spill] sm:$0xff] %v4046_v11  ;;  %4584 = vst [vmem:[#allocation38_spill] sm:$0xff] %v4049_v33 }
 0x22f   : > { %v1285_v37 = vpop.f32.mrf.mxu0  ;;  %v1374_v3 = vpop.f32.mrf.mxu1 }
 0x230   : > { %4581 = vst [vmem:[#allocation35_spill] sm:$0xff] %v4040_v0  ;;  %4582 = vst [vmem:[#allocation36_spill] sm:$0xff] %v4043_v49  ;;  %1752 = vmatprep.mubr.f32.mxu0 %v4040_v0  ;;  %1837 = vmatprep.mubr.f32.mxu1 %v4043_v49  ;;  %v4062_v8 = vadd.f32 %v1285_v37, %v3875_v48  ;;  %v4065_v14 = vadd.f32 %v1374_v3, %v3875_v48 }
 0x231   : > { %v1287_v43 = vpop.f32.mrf.mxu0  ;;  %v1376_v30 = vpop.f32.mrf.mxu1  ;;  %1753 = vmatmul.mubr.f32.gmra.mxu0 %v4046_v11  ;;  %1838 = vmatmul.mubr.f32.gmra.mxu1 %v4049_v33 }
 0x232   : > { %v4056_v46 = vadd.f32 %v1287_v43, %v3875_v48  ;;  %v4059_v10 = vadd.f32 %v1376_v30, %v3875_v48  ;;  %4587 = vst [vmem:[#allocation41_spill] sm:$0xff] %v4062_v8  ;;  %4588 = vst [vmem:[#allocation42_spill] sm:$0xff] %v4065_v14  ;;  %v4593_v43 = vmov 0.0  }
 0x233   : > { %v1291_v29 = vpop.f32.mrf.mxu0  ;;  %v1380_v7 = vpop.f32.mrf.mxu1 }
 0x234   : > { %4585 = vst [vmem:[#allocation39_spill] sm:$0xff] %v4056_v46  ;;  %4586 = vst [vmem:[#allocation40_spill] sm:$0xff] %v4059_v10  ;;  %1757 = vmatprep.mubr.f32.mxu0 %v4056_v46  ;;  %1842 = vmatprep.mubr.f32.mxu1 %v4059_v10  ;;  %v4078_v48 = vadd.f32 %v1291_v29, %v3925_v45  ;;  %v4081_v3 = vadd.f32 %v1380_v7, %v3925_v45  ;;  %v1988_v7 = vld [vmem:[%s4521_s5 + $0x1c0] sm:$0xff]  ;;  %v1981_v29 = vld [vmem:[%s4521_s5 + $0x188] sm:$0xff] }
 0x235   : > { %v1293_v6 = vpop.f32.mrf.mxu0  ;;  %v1382_v2 = vpop.f32.mrf.mxu1  ;;  %1758 = vmatmul.mubr.f32.gmra.mxu0 %v4062_v8  ;;  %1843 = vmatmul.mubr.f32.gmra.mxu1 %v4065_v14  ;;  %v1959_v10 = vld [vmem:[%s4521_s5 + $0xd8] sm:$0xff] }
 0x236   : > { %v4072_v30 = vadd.f32 %v1293_v6, %v3925_v45  ;;  %v4075_v37 = vadd.f32 %v1382_v2, %v3925_v45  ;;  %4591 = vst [vmem:[#allocation45_spill] sm:$0xff] %v4078_v48  ;;  %4592 = vst [vmem:[#allocation46_spill] sm:$0xff] %v4081_v3  ;;  %v1989_v2 = vld [vmem:[%s4521_s5 + $0x1c8] sm:$0xff]  ;;  %v1991_v6 = vld [vmem:[%s4521_s5 + $0x1d8] sm:$0xff] }
 0x237   : > { %2024 = vmatprep.subr.mxu0 %v1989_v2  ;;  %2113 = vmatprep.subr.mxu1 %v1991_v6  ;;  %v1990_v45 = vld [vmem:[%s4521_s5 + $0x1d0] sm:$0xff]  ;;  %v1980_v2 = vld [vmem:[%s4521_s5 + $0x180] sm:$0xff] }
 0x238   : > { %4589 = vst [vmem:[#allocation43_spill] sm:$0xff] %v4072_v30  ;;  %4590 = vst [vmem:[#allocation44_spill] sm:$0xff] %v4075_v37  ;;  %1762 = vmatprep.mubr.f32.mxu0 %v4072_v30  ;;  %1847 = vmatprep.mubr.f32.mxu1 %v4075_v37  ;;  %v1983_v37 = vld [vmem:[%s4521_s5 + $0x198] sm:$0xff]  ;;  %v1982_v6 = vld [vmem:[%s4521_s5 + $0x190] sm:$0xff] }
 0x239   : > { %1763 = vmatmul.mubr.f32.gmra.mxu0 %v4078_v48  ;;  %1848 = vmatmul.mubr.f32.gmra.mxu1 %v4081_v3  ;;  %v1973_v30 = vld [vmem:[%s4521_s5 + $0x148] sm:$0xff]  ;;  %v1974_v3 = vld [vmem:[%s4521_s5 + $0x150] sm:$0xff]  ;;  %v1964_v48 = vld [vmem:[%s4521_s5 + $0x100] sm:$0xff] }
 0x23a   : > { %2072 = vmatprep.mubr.f32.mxu0 %v4593_v43  ;;  %2161 = vmatprep.mubr.f32.mxu1 %v4593_v43 }
 0x23b   : > { %2025 = vmatpush1.msra.mxu0 %v1988_v7  ;;  %2114 = vmatpush1.msra.mxu1 %v1990_v45  ;;  %v1975_v7 = vld [vmem:[%s4521_s5 + $0x158] sm:$0xff]  ;;  %v1972_v45 = vld [vmem:[%s4521_s5 + $0x140] sm:$0xff] }
 0x23c   : > { %2026 = vmatprep.subr.mxu0 %v1981_v29  ;;  %2115 = vmatprep.subr.mxu1 %v1983_v37  ;;  %v1965_v37 = vld [vmem:[%s4521_s5 + $0x108] sm:$0xff]  ;;  %v1967_v29 = vld [vmem:[%s4521_s5 + $0x118] sm:$0xff] }
 0x23d   : > { %2027 = vmatpush1.msra.mxu0 %v1980_v2  ;;  %2116 = vmatpush1.msra.mxu1 %v1982_v6  ;;  %v1966_v2 = vld [vmem:[%s4521_s5 + $0x110] sm:$0xff]  ;;  %v1957_v6 = vld [vmem:[%s4521_s5 + $0xc8] sm:$0xff] }
 0x23e   : > { %2028 = vmatprep.subr.mxu0 %v1973_v30  ;;  %2117 = vmatprep.subr.mxu1 %v1975_v7  ;;  %v1956_v30 = vld [vmem:[%s4521_s5 + $0xc0] sm:$0xff]  ;;  %v1958_v7 = vld [vmem:[%s4521_s5 + $0xd0] sm:$0xff] }
 0x23f   : > { %2029 = vmatpush1.msra.mxu0 %v1972_v45  ;;  %2118 = vmatpush1.msra.mxu1 %v1974_v3  ;;  %v1949_v3 = vld [vmem:[%s4521_s5 + $0x88] sm:$0xff]  ;;  %v1951_v45 = vld [vmem:[%s4521_s5 + $0x98] sm:$0xff] }
 0x240   : > { %2030 = vmatprep.subr.mxu0 %v1965_v37  ;;  %2119 = vmatprep.subr.mxu1 %v1967_v29  ;;  %v1948_v37 = vld [vmem:[%s4521_s5 + $0x80] sm:$0xff]  ;;  %v1950_v29 = vld [vmem:[%s4521_s5 + $0x90] sm:$0xff] }
 0x241   : > { %2031 = vmatpush1.msra.mxu0 %v1964_v48  ;;  %2120 = vmatpush1.msra.mxu1 %v1966_v2  ;;  %v1941_v48 = vld [vmem:[%s4521_s5 + $0x48] sm:$0xff]  ;;  %v1943_v2 = vld [vmem:[%s4521_s5 + $0x58] sm:$0xff] }
 0x242   : > { %2032 = vmatprep.subr.mxu0 %v1957_v6  ;;  %2121 = vmatprep.subr.mxu1 %v1959_v10  ;;  %v1940_v10 = vld [vmem:[%s4521_s5 + $0x40] sm:$0xff]  ;;  %v1942_v6 = vld [vmem:[%s4521_s5 + $0x50] sm:$0xff] }
 0x243   : > { %2033 = vmatpush1.msra.mxu0 %v1956_v30  ;;  %2122 = vmatpush1.msra.mxu1 %v1958_v7  ;;  %v1933_v30 = vld [vmem:[%s4521_s5 + $0x8] sm:$0xff]  ;;  %v1935_v7 = vld [vmem:[%s4521_s5 + $0x18] sm:$0xff] }
 0x244   : > { %2034 = vmatprep.subr.mxu0 %v1949_v3  ;;  %2123 = vmatprep.subr.mxu1 %v1951_v45  ;;  %v1932_v3 = vld [vmem:[%s4521_s5] sm:$0xff]  ;;  %v1934_v45 = vld [vmem:[%s4521_s5 + $0x10] sm:$0xff] }
 0x245   : > { %2035 = vmatpush1.msra.mxu0 %v1948_v37  ;;  %2124 = vmatpush1.msra.mxu1 %v1950_v29  ;;  %v1993_v37 = vld [vmem:[%s4521_s5 + $0x1e8] sm:$0xff]  ;;  %v1995_v29 = vld [vmem:[%s4521_s5 + $0x1f8] sm:$0xff] }
 0x246   : > { %2036 = vmatprep.subr.mxu0 %v1941_v48  ;;  %2125 = vmatprep.subr.mxu1 %v1943_v2 }
 0x247   : > { %2037 = vmatpush1.msra.mxu0 %v1940_v10  ;;  %2126 = vmatpush1.msra.mxu1 %v1942_v6 }
 0x248   : > { %2038 = vmatprep.subr.mxu0 %v1933_v30  ;;  %2127 = vmatprep.subr.mxu1 %v1935_v7 }
 0x249   : > { %2039 = vmatpush1.msra.mxu0 %v1932_v3  ;;  %2128 = vmatpush1.msra.mxu1 %v1934_v45 }
 0x24a   : > { %2202 = vmatprep.subr.mxu0 %v1993_v37  ;;  %2291 = vmatprep.subr.mxu1 %v1995_v29 }
 0x2c3   : > { %v2663_v48 = vpop.f32.mrf.mxu0  ;;  %v2707_v2 = vpop.f32.mrf.mxu1 }
 0x2c5   : > { %v2664_v46 = vpop.f32.mrf.mxu0  ;;  %v2708_v14 = vpop.f32.mrf.mxu1 }
 0x2c6   : > { %v2665_v37 = vadd.f32 %v2664_v46, %v2663_v48  ;;  %v2709_v29 = vadd.f32 %v2708_v14, %v2707_v2 }
 0x2c8   : > { %v1665_v51 = vadd.f32 %v2709_v29, %v2665_v37  ;;  %v1863_v37 = vpop.permute.xlu1 %1862 }
 0x2d2   : > { %v2666_v10 = vpop.f32.mrf.mxu0  ;;  %v2710_v6 = vpop.f32.mrf.mxu1 }
 0x2d4   : > { %v2667_v8 = vpop.f32.mrf.mxu0  ;;  %v2711_v1 = vpop.f32.mrf.mxu1 }
 0x2d5   : > { %v2668_v59 = vadd.f32 %v2667_v8, %v2666_v10  ;;  %v2712_v50 = vadd.f32 %v2711_v1, %v2710_v6  ;;  %v1859_v10 = vpop.permute.xlu0 %1858 }
 0x2d7   : > { %v1670_v28 = vadd.f32 %v2712_v50, %v2668_v59 }
 0x2d8   : > { %v2669_v63 = vpop.f32.mrf.mxu0  ;;  %v2713_v49 = vpop.f32.mrf.mxu1 }
 0x2da   : > { %v2670_v0 = vpop.f32.mrf.mxu0  ;;  %v2714_v33 = vpop.f32.mrf.mxu1 }
 0x2db   : > { %v2671_v9 = vadd.f32 %v2670_v0, %v2669_v63  ;;  %v2715_v26 = vadd.f32 %v2714_v33, %v2713_v49 }
 0x2dd   : > { %v1675_v2 = vadd.f32 %v2715_v26, %v2671_v9 }
 0x2de   : > { %v2672_v11 = vpop.f32.mrf.mxu0  ;;  %v2716_v62 = vpop.f32.mrf.mxu1 }
 0x2e0   : > { %v2673_v30 = vpop.f32.mrf.mxu0  ;;  %v2717_v7 = vpop.f32.mrf.mxu1 }
 0x2e1   : > { %v2674_v8 = vadd.f32 %v2673_v30, %v2672_v11  ;;  %v2718_v6 = vadd.f32 %v2717_v7, %v2716_v62  ;;  %v1867_v11 = vpop.permute.xlu1 %1866 }
 0x2ed   : > { %v2751_v3 = vpop.f32.mrf.mxu0  ;;  %v2795_v45 = vpop.f32.mrf.mxu1 }
 0x2ef   : > { %v2752_v61 = vpop.f32.mrf.mxu0  ;;  %v2796_v60 = vpop.f32.mrf.mxu1 }
 0x2f0   : > { %v2753_v36 = vadd.f32 %v2752_v61, %v2751_v3  ;;  %v2797_v46 = vadd.f32 %v2796_v60, %v2795_v45  ;;  %v1680_v60 = vadd.f32 %v2718_v6, %v2674_v8  ;;  %v1894_v8 = vpop.permute.xlu1 %1893 }
 0x2f1   : > { %v2754_v58 = vpop.f32.mrf.mxu0  ;;  %v2798_v55 = vpop.f32.mrf.mxu1 }
 0x2f2   : > { %v1750_v27 = vadd.f32 %v2753_v36, %v1665_v51 }
 0x2f3   : > { %v2755_v54 = vpop.f32.mrf.mxu0  ;;  %v2799_v23 = vpop.f32.mrf.mxu1 }
 0x2f4   : > { %v2756_v42 = vadd.f32 %v2755_v54, %v2754_v58  ;;  %v2800_v48 = vadd.f32 %v2799_v23, %v2798_v55  ;;  %v1835_v3 = vadd.f32 %v2797_v46, %v1750_v27 }
 0x2f5   : > { %v2757_v41 = vpop.f32.mrf.mxu0  ;;  %v2801_v25 = vpop.f32.mrf.mxu1 }
 0x2f6   : > { %v1755_v14 = vadd.f32 %v2756_v42, %v1670_v28  ;;  %v1869_v28 = vmul.f32 %v1855_v47, %v1835_v3 }
 0x2f7   : > { %v2758_v1 = vpop.f32.mrf.mxu0  ;;  %v2802_v61 = vpop.f32.mrf.mxu1 }
 0x2f8   : > { %v1840_v63 = vadd.f32 %v2800_v48, %v1755_v14  ;;  %v2759_v0 = vadd.f32 %v2758_v1, %v2757_v41  ;;  %v2803_v54 = vadd.f32 %v2802_v61, %v2801_v25  ;;  %v1874_v41 = vsel %vm1873_vm1, %v1869_v28, 0.0 }
 0x2f9   : > { %v2760_v49 = vpop.f32.mrf.mxu0  ;;  %v2804_v33 = vpop.f32.mrf.mxu1 }
 0x2fa   : > { %v1870_v59 = vmul.f32 %v1859_v10, %v1840_v63  ;;  %v1760_v36 = vadd.f32 %v2759_v0, %v1675_v2  ;;  %v1890_v10 = vpop.permute.xlu0 %1889  ;;  %v1898_v63 = vpop.permute.xlu1 %1897 }
 0x2fb   : > { %v2761_v58 = vpop.f32.mrf.mxu0  ;;  %v2805_v50 = vpop.f32.mrf.mxu1 }
 0x2fc   : > { %v1845_v55 = vadd.f32 %v2803_v54, %v1760_v36  ;;  %v2762_v26 = vadd.f32 %v2761_v58, %v2760_v49  ;;  %v1875_v9 = vsel %vm1873_vm1, %v1870_v59, 0.0  ;;  %v2806_v27 = vadd.f32 %v2805_v50, %v2804_v33 }
 0x2fd   : > { %v1876_v30 = vadd.f32 %v1875_v9, %v1874_v41 }
 0x2fe   : > { %v1871_v23 = vmul.f32 %v1863_v37, %v1845_v55  ;;  %v1765_v62 = vadd.f32 %v2762_v26, %v1680_v60  ;;  %v1902_v59 = vpop.permute.xlu0 %1901 }
 0x300   : > { %v1877_v42 = vsel %vm1873_vm1, %v1871_v23, 0.0  ;;  %v1850_v51 = vadd.f32 %v2806_v27, %v1765_v62  ;;  %v1992_v23 = vld [vmem:[%s4521_s5 + $0x1e0] sm:$0xff]  ;;  %v1994_v62 = vld [vmem:[%s4521_s5 + $0x1f0] sm:$0xff] }
 0x301   : > { %v1878_v7 = vadd.f32 %v1877_v42, %v1876_v30  ;;  %v1985_v42 = vld [vmem:[%s4521_s5 + $0x1a8] sm:$0xff]  ;;  %v1986_v30 = vld [vmem:[%s4521_s5 + $0x1b0] sm:$0xff] }
 0x302   : > { %v1872_v25 = vmul.f32 %v1867_v11, %v1850_v51  ;;  %v1987_v51 = vld [vmem:[%s4521_s5 + $0x1b8] sm:$0xff]  ;;  %v1984_v11 = vld [vmem:[%s4521_s5 + $0x1a0] sm:$0xff] }
 0x304   : > { %v1879_v45 = vsel %vm1873_vm1, %v1872_v25, 0.0  ;;  %v1977_v25 = vld [vmem:[%s4521_s5 + $0x168] sm:$0xff] }
 0x305   : > { %v1880_v47 = vadd.f32 %v1879_v45, %v1878_v7  ;;  %v1979_v7 = vld [vmem:[%s4521_s5 + $0x178] sm:$0xff] }
 0x307   : > { %v1881_v29 = vrot.slane %v1880_v47, 4 }
 0x309   : > { %v1882_v46 = vadd.f32 %v1881_v29, %v1880_v47  ;;  %v1976_v47 = vld [vmem:[%s4521_s5 + $0x160] sm:$0xff]  ;;  %v1978_v29 = vld [vmem:[%s4521_s5 + $0x170] sm:$0xff] }
 0x30b   : > { %v1883_v14 = vrot.slane %v1882_v46, 2 }
 0x30d   : > { %v1884_v48 = vadd.f32 %v1883_v14, %v1882_v46  ;;  %v1969_v46 = vld [vmem:[%s4521_s5 + $0x128] sm:$0xff]  ;;  %v1971_v14 = vld [vmem:[%s4521_s5 + $0x138] sm:$0xff] }
 0x30f   : > { %v1885_v2 = vrot.slane %v1884_v48, 1 }
 0x311   : > { %v1886_v1 = vadd.f32 %v1885_v2, %v1884_v48  ;;  %v1968_v48 = vld [vmem:[%s4521_s5 + $0x120] sm:$0xff]  ;;  %v1970_v2 = vld [vmem:[%s4521_s5 + $0x130] sm:$0xff] }
 0x313   : > { %v1887_v61 = vmax.f32 %v1886_v1, 0.0  ;;  %v1963_v1 = vld [vmem:[%s4521_s5 + $0xf8] sm:$0xff] }
 0x315   : > { %v1904_v6 = vmul.f32 %v1890_v10, %v1887_v61  ;;  %v1905_v3 = vmul.f32 %v1894_v8, %v1887_v61  ;;  %v1906_v33 = vmul.f32 %v1898_v63, %v1887_v61  ;;  %v1907_v36 = vmul.f32 %v1902_v59, %v1887_v61  ;;  %v1961_v8 = vld [vmem:[%s4521_s5 + $0xe8] sm:$0xff]  ;;  %v1960_v10 = vld [vmem:[%s4521_s5 + $0xe0] sm:$0xff]  ;;  %v1955_v63 = vld [vmem:[%s4521_s5 + $0xb8] sm:$0xff] }
 0x317   : > { %v2604_v0 = vmul.f32 -1.442695, %v1904_v6  ;;  %v2605_v49 = vmul.f32 -1.442695, %v1905_v3  ;;  %v2606_v37 = vmul.f32 -1.442695, %v1906_v33 }
 0x318   : > { %v2607_v54 = vmul.f32 -1.442695, %v1907_v36  ;;  %v1962_v6 = vld [vmem:[%s4521_s5 + $0xf0] sm:$0xff]  ;;  %v1953_v3 = vld [vmem:[%s4521_s5 + $0xa8] sm:$0xff]  ;;  %v1944_v36 = vld [vmem:[%s4521_s5 + $0x60] sm:$0xff] }
 0x319   : > { %2876 = vpow2.f32 %v2604_v0  ;;  %v1952_v0 = vld [vmem:[%s4521_s5 + $0xa0] sm:$0xff]  ;;  %v1945_v33 = vld [vmem:[%s4521_s5 + $0x68] sm:$0xff] }
 0x31a   : > { %2878 = vpow2.f32 %v2605_v49  ;;  %v1954_v49 = vld [vmem:[%s4521_s5 + $0xb0] sm:$0xff] }
 0x31b   : > { %2880 = vpow2.f32 %v2606_v37  ;;  %v1947_v37 = vld [vmem:[%s4521_s5 + $0x78] sm:$0xff] }
 0x31c   : > { %2882 = vpow2.f32 %v2607_v54  ;;  %v1946_v54 = vld [vmem:[%s4521_s5 + $0x70] sm:$0xff] }
 0x326   : > { %v2877_v58 = vpop.eup %2876 }
 0x327   : > { %v2879_v50 = vpop.eup %2878  ;;  %v1920_v60 = vadd.f32 1.0, %v2877_v58  ;;  %v1937_v58 = vld [vmem:[%s4521_s5 + $0x28] sm:$0xff] }
 0x328   : > { %v1921_v28 = vadd.f32 1.0, %v2879_v50  ;;  %v2881_v55 = vpop.eup %2880  ;;  %v1939_v50 = vld [vmem:[%s4521_s5 + $0x38] sm:$0xff] }
 0x329   : > { %2884 = vrcp.f32 %v1920_v60  ;;  %v1922_v26 = vadd.f32 1.0, %v2881_v55  ;;  %v2883_v9 = vpop.eup %2882  ;;  %v1936_v60 = vld [vmem:[%s4521_s5 + $0x20] sm:$0xff]  ;;  %v4327_v55 = vpop.permute.xlu1 %949 }
 0x32a   : > { %2886 = vrcp.f32 %v1921_v28  ;;  %v1923_v41 = vadd.f32 1.0, %v2883_v9  ;;  %v1938_v28 = vld [vmem:[%s4521_s5 + $0x30] sm:$0xff] }
 0x32b   : > { %2888 = vrcp.f32 %v1922_v26 }
 0x32c   : > { %2890 = vrcp.f32 %v1923_v41 }
 0x336   : > { %v4201_v27 = vpop.eup %2884 }
 0x337   : > { %2608 = vmatmul.mubr.msk.f32.vlgmr.msra.gmra.mxu0 %vm1873_vm1, %v4201_v27  ;;  %2612 = vmatmul.mubr.msk.f32.vlgmr.msra.gmra.mxu1 %vm1873_vm1, %v4201_v27  ;;  %v4227_v45 = vpop.eup %2886 }
 0x338   : > { %2203 = vmatpush1.msra.mxu0 %v1992_v23  ;;  %2292 = vmatpush1.msra.mxu1 %v1994_v62  ;;  %v2889_v61 = vpop.eup %2888  ;;  %v964_v23 = vadd.f32 %v4327_v55, %v3417_v56 }
 0x339   : > { %2204 = vmatprep.subr.mxu0 %v1985_v42  ;;  %2293 = vmatprep.subr.mxu1 %v1987_v51  ;;  %v2891_v59 = vpop.eup %2890  ;;  %v967_v51 = vadd.f32 %v4327_v55, %v3427_v5 }
 0x33a   : > { %2078 = vmatprep.mubr.f32.mxu0 %v4593_v43  ;;  %2167 = vmatprep.mubr.f32.mxu1 %v4593_v43 }
 0x33b   : > { %2205 = vmatpush1.msra.mxu0 %v1984_v11  ;;  %2294 = vmatpush1.msra.mxu1 %v1986_v30  ;;  %v4340_v30 = vpop.permute.xlu0 %953 }
 0x33c   : > { %2609 = vmatmul.mubr.msk.f32.gmra.mxu0 %vm1873_vm1, %v4227_v45  ;;  %2613 = vmatmul.mubr.msk.f32.gmra.mxu1 %vm1873_vm1, %v4227_v45 }
 0x33d   : > { %2206 = vmatprep.subr.mxu0 %v1977_v25  ;;  %2295 = vmatprep.subr.mxu1 %v1979_v7 }
 0x33e   : > { %2207 = vmatpush1.msra.mxu0 %v1976_v47  ;;  %2296 = vmatpush1.msra.mxu1 %v1978_v29 }
 0x33f   : > { %2208 = vmatprep.subr.mxu0 %v1969_v46  ;;  %2297 = vmatprep.subr.mxu1 %v1971_v14  ;;  %v974_v14 = vadd.f32 %v4340_v30, %v3431_v16 }
 0x340   : > { %2084 = vmatprep.mubr.f32.mxu0 %v4593_v43  ;;  %2173 = vmatprep.mubr.f32.mxu1 %v4593_v43 }
 0x341   : > { %2209 = vmatpush1.msra.mxu0 %v1968_v48  ;;  %2298 = vmatpush1.msra.mxu1 %v1970_v2 }
 0x342   : > { %2610 = vmatmul.mubr.msk.f32.gmra.mxu0 %vm1873_vm1, %v2889_v61  ;;  %2614 = vmatmul.mubr.msk.f32.gmra.mxu1 %vm1873_vm1, %v2889_v61 }
 0x343   : > { %2210 = vmatprep.subr.mxu0 %v1961_v8  ;;  %2299 = vmatprep.subr.mxu1 %v1963_v1 }
 0x344   : > { %2211 = vmatpush1.msra.mxu0 %v1960_v10  ;;  %2300 = vmatpush1.msra.mxu1 %v1962_v6 }
 0x345   : > { %2212 = vmatprep.subr.mxu0 %v1953_v3  ;;  %2301 = vmatprep.subr.mxu1 %v1955_v63 }
 0x346   : > { %2090 = vmatprep.mubr.f32.mxu0 %v4593_v43  ;;  %2179 = vmatprep.mubr.f32.mxu1 %v4593_v43 }
 0x347   : > { %2213 = vmatpush1.msra.mxu0 %v1952_v0  ;;  %2302 = vmatpush1.msra.mxu1 %v1954_v49 }
 0x348   : > { %2611 = vmatmul.mubr.msk.f32.gmra.mxu0 %vm1873_vm1, %v2891_v59  ;;  %2615 = vmatmul.mubr.msk.f32.gmra.mxu1 %vm1873_vm1, %v2891_v59 }
 0x349   : > { %2214 = vmatprep.subr.mxu0 %v1945_v33  ;;  %2303 = vmatprep.subr.mxu1 %v1947_v37 }
 0x34a   : > { %2215 = vmatpush1.msra.mxu0 %v1944_v36  ;;  %2304 = vmatpush1.msra.mxu1 %v1946_v54 }
 0x34b   : > { %2216 = vmatprep.subr.mxu0 %v1937_v58  ;;  %2305 = vmatprep.subr.mxu1 %v1939_v50 }
 0x34c   : > { %2217 = vmatpush1.msra.mxu0 %v1936_v60  ;;  %2250 = vmatprep.mubr.f32.mxu0 %v4593_v43 }
 0x34d   : > { %2306 = vmatpush1.msra.mxu1 %v1938_v28  ;;  %2339 = vmatprep.mubr.f32.mxu1 %v4593_v43 }
 0x34e   : > { %2616 = vmatmul.mubr.msk.f32.vlgmr.msra.gmra.mxu0 %vm1873_vm1, %v4201_v27  ;;  %2620 = vmatmul.mubr.msk.f32.vlgmr.msra.gmra.mxu1 %vm1873_vm1, %v4201_v27  ;;  %v966_v27 = vadd.f32 %v4327_v55, %v3419_v57 }
 0x34f   : > { %2256 = vmatprep.mubr.f32.mxu0 %v4593_v43  ;;  %2345 = vmatprep.mubr.f32.mxu1 %v4593_v43 }
 0x352   : > { %2617 = vmatmul.mubr.msk.f32.gmra.mxu0 %vm1873_vm1, %v4227_v45  ;;  %2621 = vmatmul.mubr.msk.f32.gmra.mxu1 %vm1873_vm1, %v4227_v45 }
 0x353   : > { %2262 = vmatprep.mubr.f32.mxu0 %v4593_v43  ;;  %2351 = vmatprep.mubr.f32.mxu1 %v4593_v43 }
 0x356   : > { %2618 = vmatmul.mubr.msk.f32.gmra.mxu0 %vm1873_vm1, %v2889_v61  ;;  %2622 = vmatmul.mubr.msk.f32.gmra.mxu1 %vm1873_vm1, %v2889_v61 }
 0x357   : > { %2268 = vmatprep.mubr.f32.mxu0 %v4593_v43  ;;  %2357 = vmatprep.mubr.f32.mxu1 %v4593_v43  ;;  %v965_v43 = vadd.f32 %v4327_v55, %v3425_v4  ;;  %v972_v4 = vadd.f32 %v4340_v30, %v3429_v15  ;;  %v973_v15 = vadd.f32 %v4340_v30, %v3438_v17 }
 0x35a   : > { %2619 = vmatmul.mubr.msk.f32.gmra.mxu0 %vm1873_vm1, %v2891_v59  ;;  %2623 = vmatmul.mubr.msk.f32.gmra.mxu1 %vm1873_vm1, %v2891_v59 }
 0x3f7   : > { %v2074_v26 = vpop.f32.mrf.mxu0  ;;  %v2163_v9 = vpop.f32.mrf.mxu1 }
 0x3f8   : > { %v2364_v62 = vmul.f32 %v2074_v26, %v3777_v34  ;;  %v2366_v41 = vmul.f32 %v2163_v9, %v3768_v13 }
 0x3f9   : > { %v2076_v42 = vpop.f32.mrf.mxu0  ;;  %v2165_v11 = vpop.f32.mrf.mxu1 }
 0x3fa   : > { %v2396_v25 = vadd.f32 %v2364_v62, %v964_v23  ;;  %v2398_v7 = vadd.f32 %v2366_v41, %v966_v27  ;;  %v2365_v56 = vmul.f32 %v2076_v42, %v3771_v35  ;;  %v2367_v34 = vmul.f32 %v2165_v11, %v3774_v32  ;;  %v4594_v62 = vld [vmem:[#allocation8_spill] sm:$0xff]  ;;  %v4595_v42 = vld [vmem:[#allocation29_spill] sm:$0xff] }
 0x3fc   : > { %v2428_v45 = vmax.f32 %v2396_v25, 0.0  ;;  %v2430_v57 = vmax.f32 %v2398_v7, 0.0  ;;  %v2397_v47 = vadd.f32 %v2365_v56, %v965_v43  ;;  %v2399_v13 = vadd.f32 %v2367_v34, %v967_v51  ;;  %v2080_v29 = vpop.f32.mrf.mxu0  ;;  %v2169_v46 = vpop.f32.mrf.mxu1  ;;  %v4596_v51 = vld [vmem:[#allocation30_spill] sm:$0xff]  ;;  %v4597_v25 = vld [vmem:[#allocation9_spill] sm:$0xff] }
 0x3fd   : > { %v2372_v5 = vmul.f32 %v2080_v29, %v3864_v18  ;;  %v2374_v48 = vmul.f32 %v2169_v46, %v3867_v44  ;;  %v975_v18 = vadd.f32 %v4340_v30, %v3440_v12  ;;  %v4358_v44 = vpop.permute.xlu1 %957  ;;  %v4598_v34 = vld [vmem:[#allocation10_spill] sm:$0xff]  ;;  %v4600_v46 = vld [vmem:[#allocation28_spill] sm:$0xff] }
 0x3fe   : > { %2460 = vst [vmem:[%s4350_s12] sm:$0xff] %v2428_v45  ;;  %2462 = vst [vmem:[%s4350_s12 + $0x10] sm:$0xff] %v2430_v57  ;;  %v2429_v35 = vmax.f32 %v2397_v47, 0.0  ;;  %v2431_v32 = vmax.f32 %v2399_v13, 0.0  ;;  %v2082_v2 = vpop.f32.mrf.mxu0  ;;  %v2171_v16 = vpop.f32.mrf.mxu1  ;;  %v980_v12 = vadd.f32 %v4358_v44, %v3453_v19  ;;  %v982_v49 = vadd.f32 %v4358_v44, %v3455_v20  ;;  %v4599_v13 = vld [vmem:[#allocation27_spill] sm:$0xff] }
 0x3ff   : > { %v2404_v8 = vadd.f32 %v2372_v5, %v972_v4  ;;  %v2406_v1 = vadd.f32 %v2374_v48, %v974_v14  ;;  %v2373_v61 = vmul.f32 %v2082_v2, %v3852_v39  ;;  %v2375_v10 = vmul.f32 %v2171_v16, %v3855_v40  ;;  %v4602_v2 = vld [vmem:[#allocation12_spill] sm:$0xff] }
 0x400   : > { %2461 = vst [vmem:[%s4350_s12 + $0x8] sm:$0xff] %v2429_v35  ;;  %2463 = vst [vmem:[%s4350_s12 + $0x18] sm:$0xff] %v2431_v32  ;;  %v981_v36 = vadd.f32 %v4358_v44, %v3461_v21  ;;  %v983_v19 = vadd.f32 %v4358_v44, %v3463_v22  ;;  %v4601_v32 = vld [vmem:[#allocation11_spill] sm:$0xff] }
 0x401   : > { %v2436_v6 = vmax.f32 %v2404_v8, 0.0  ;;  %v2438_v3 = vmax.f32 %v2406_v1, 0.0  ;;  %v2405_v17 = vadd.f32 %v2373_v61, %v973_v15  ;;  %v2407_v63 = vadd.f32 %v2375_v10, %v975_v18  ;;  %v4376_v50 = vpop.permute.xlu1 %961  ;;  %v4603_v10 = vld [vmem:[#allocation33_spill] sm:$0xff] }
 0x402   : > { %v2086_v0 = vpop.f32.mrf.mxu0  ;;  %v2175_v33 = vpop.f32.mrf.mxu1  ;;  %v988_v22 = vadd.f32 %v4376_v50, %v3476_v24  ;;  %v990_v27 = vadd.f32 %v4376_v50, %v4594_v62  ;;  %v989_v7 = vadd.f32 %v4376_v50, %v4597_v25  ;;  %v991_v24 = vadd.f32 %v4376_v50, %v4598_v34  ;;  %v4612_v62 = vld [vmem:[#allocation18_spill] sm:$0xff]  ;;  %v4616_v34 = vld [vmem:[#allocation36_spill] sm:$0xff] }
 0x403   : > { %2468 = vst [vmem:[%s4350_s12 + $0x40] sm:$0xff] %v2436_v6  ;;  %2470 = vst [vmem:[%s4350_s12 + $0x50] sm:$0xff] %v2438_v3  ;;  %v2437_v39 = vmax.f32 %v2405_v17, 0.0  ;;  %v2439_v40 = vmax.f32 %v2407_v63, 0.0  ;;  %v2380_v37 = vmul.f32 %v2086_v0, %v3906_v38  ;;  %v2382_v59 = vmul.f32 %v2175_v33, %v3909_v31  ;;  %v4604_v3 = vld [vmem:[#allocation34_spill] sm:$0xff]  ;;  %v4605_v63 = vld [vmem:[#allocation13_spill] sm:$0xff] }
 0x404   : > { %v2088_v54 = vpop.f32.mrf.mxu0  ;;  %v2177_v58 = vpop.f32.mrf.mxu1  ;;  %v968_v15 = vadd.f32 %v4327_v55, %v4601_v32  ;;  %v970_v18 = vadd.f32 %v4327_v55, %v4602_v2  ;;  %v4606_v0 = vld [vmem:[#allocation14_spill] sm:$0xff]  ;;  %v4621_v2 = vld [vmem:[#allocation21_spill] sm:$0xff] }
 0x405   : > { %2469 = vst [vmem:[%s4350_s12 + $0x48] sm:$0xff] %v2437_v39  ;;  %2471 = vst [vmem:[%s4350_s12 + $0x58] sm:$0xff] %v2439_v40  ;;  %v2412_v20 = vadd.f32 %v2380_v37, %v980_v12  ;;  %v2414_v60 = vadd.f32 %v2382_v59, %v982_v49  ;;  %v2381_v38 = vmul.f32 %v2088_v54, %v3892_v52  ;;  %v4607_v59 = vld [vmem:[#allocation31_spill] sm:$0xff]  ;;  %v4608_v54 = vld [vmem:[#allocation32_spill] sm:$0xff] }
 0x406   : > { %v2383_v31 = vmul.f32 %v2177_v58, %v3895_v53  ;;  %v969_v12 = vadd.f32 %v4327_v55, %v4605_v63  ;;  %v971_v49 = vadd.f32 %v4327_v55, %v4606_v0  ;;  %v4609_v58 = vld [vmem:[#allocation15_spill] sm:$0xff]  ;;  %v4620_v32 = vld [vmem:[#allocation42_spill] sm:$0xff] }
 0x407   : > { %v2444_v28 = vmax.f32 %v2412_v20, 0.0  ;;  %v2446_v26 = vmax.f32 %v2414_v60, 0.0  ;;  %v2413_v21 = vadd.f32 %v2381_v38, %v981_v36  ;;  %v976_v20 = vadd.f32 %v4340_v30, %v4609_v58  ;;  %v4610_v60 = vld [vmem:[#allocation16_spill] sm:$0xff]  ;;  %v4623_v0 = vld [vmem:[#allocation23_spill] sm:$0xff] }
 0x408   : > { %v2415_v9 = vadd.f32 %v2383_v31, %v983_v19  ;;  %v2092_v23 = vpop.f32.mrf.mxu0  ;;  %v2181_v41 = vpop.f32.mrf.mxu1  ;;  %v978_v38 = vadd.f32 %v4340_v30, %v4610_v60 }
 0x409   : > { %2476 = vst [vmem:[%s4350_s12 + $0x80] sm:$0xff] %v2444_v28  ;;  %2478 = vst [vmem:[%s4350_s12 + $0x90] sm:$0xff] %v2446_v26  ;;  %v2445_v43 = vmax.f32 %v2413_v21, 0.0  ;;  %v2388_v53 = vmul.f32 %v2092_v23, %v4595_v42  ;;  %v2390_v11 = vmul.f32 %v2181_v41, %v4596_v51  ;;  %v4613_v41 = vld [vmem:[#allocation37_spill] sm:$0xff] }
 0x40a   : > { %v2447_v52 = vmax.f32 %v2415_v9, 0.0  ;;  %v2094_v56 = vpop.f32.mrf.mxu0  ;;  %v2183_v45 = vpop.f32.mrf.mxu1 }
 0x40b   : > { %2477 = vst [vmem:[%s4350_s12 + $0x88] sm:$0xff] %v2445_v43  ;;  %v2420_v57 = vadd.f32 %v2388_v53, %v988_v22  ;;  %v2422_v47 = vadd.f32 %v2390_v11, %v990_v27  ;;  %v2389_v29 = vmul.f32 %v2094_v56, %v4599_v13  ;;  %v2391_v4 = vmul.f32 %v2183_v45, %v4600_v46  ;;  %v4611_v22 = vld [vmem:[#allocation17_spill] sm:$0xff]  ;;  %v4617_v45 = vld [vmem:[#allocation19_spill] sm:$0xff] }
 0x40c   : > { %2479 = vst [vmem:[%s4350_s12 + $0x98] sm:$0xff] %v2447_v52  ;;  %v977_v23 = vadd.f32 %v4340_v30, %v4611_v22  ;;  %v979_v27 = vadd.f32 %v4340_v30, %v4612_v62  ;;  %v4614_v52 = vld [vmem:[#allocation38_spill] sm:$0xff]  ;;  %v4618_v30 = vld [vmem:[#allocation20_spill] sm:$0xff] }
 0x40d   : > { %v2452_v5 = vmax.f32 %v2420_v57, 0.0  ;;  %v2454_v14 = vmax.f32 %v2422_v47, 0.0  ;;  %v2421_v48 = vadd.f32 %v2389_v29, %v989_v7  ;;  %v2423_v35 = vadd.f32 %v2391_v4, %v991_v24  ;;  %v4615_v7 = vld [vmem:[#allocation35_spill] sm:$0xff] }
 0x40e   : > { %v2252_v16 = vpop.f32.mrf.mxu0  ;;  %v2341_v8 = vpop.f32.mrf.mxu1  ;;  %v984_v57 = vadd.f32 %v4358_v44, %v4617_v45  ;;  %v986_v47 = vadd.f32 %v4358_v44, %v4618_v30 }
 0x40f   : > { %2484 = vst [vmem:[%s4350_s12 + $0xc0] sm:$0xff] %v2452_v5  ;;  %2486 = vst [vmem:[%s4350_s12 + $0xd0] sm:$0xff] %v2454_v14  ;;  %v2453_v1 = vmax.f32 %v2421_v48, 0.0  ;;  %v2455_v61 = vmax.f32 %v2423_v35, 0.0  ;;  %v2368_v6 = vmul.f32 %v2252_v16, %v4603_v10  ;;  %v2370_v17 = vmul.f32 %v2341_v8, %v4604_v3  ;;  %v4619_v48 = vld [vmem:[#allocation41_spill] sm:$0xff]  ;;  %v4622_v16 = vld [vmem:[#allocation22_spill] sm:$0xff] }
 0x410   : > { %v2254_v33 = vpop.f32.mrf.mxu0  ;;  %v2343_v39 = vpop.f32.mrf.mxu1  ;;  %v987_v8 = vadd.f32 %v4358_v44, %v4622_v16 }
 0x411   : > { %2485 = vst [vmem:[%s4350_s12 + $0xc8] sm:$0xff] %v2453_v1  ;;  %2487 = vst [vmem:[%s4350_s12 + $0xd8] sm:$0xff] %v2455_v61  ;;  %v2400_v40 = vadd.f32 %v2368_v6, %v968_v15  ;;  %v2402_v37 = vadd.f32 %v2370_v17, %v970_v18  ;;  %v2369_v36 = vmul.f32 %v2254_v33, %v4607_v59  ;;  %v4624_v33 = vld [vmem:[#allocation24_spill] sm:$0xff] }
 0x412   : > { %v2371_v19 = vmul.f32 %v2343_v39, %v4608_v54  ;;  %v2258_v31 = vpop.f32.mrf.mxu0  ;;  %v2347_v55 = vpop.f32.mrf.mxu1  ;;  %v985_v18 = vadd.f32 %v4358_v44, %v4621_v2  ;;  %v994_v39 = vadd.f32 %v4376_v50, %v4624_v33 }
 0x413   : > { %v2432_v28 = vmax.f32 %v2400_v40, 0.0  ;;  %v2434_v26 = vmax.f32 %v2402_v37, 0.0  ;;  %v2401_v21 = vadd.f32 %v2369_v36, %v969_v12  ;;  %v2376_v43 = vmul.f32 %v2258_v31, %v4613_v41  ;;  %v4625_v40 = vld [vmem:[#allocation39_spill] sm:$0xff]  ;;  %v4626_v37 = vld [vmem:[#allocation40_spill] sm:$0xff] }
 0x414   : > { %v2403_v9 = vadd.f32 %v2371_v19, %v971_v49  ;;  %v2378_v42 = vmul.f32 %v2347_v55, %v4614_v52  ;;  %v2260_v53 = vpop.f32.mrf.mxu0  ;;  %v2349_v51 = vpop.f32.mrf.mxu1  ;;  %v992_v49 = vadd.f32 %v4376_v50, %v4623_v0  ;;  %v4629_v55 = vld [vmem:[#allocation25_spill] sm:$0xff] }
 0x415   : > { %2464 = vst [vmem:[%s4350_s12 + $0x20] sm:$0xff] %v2432_v28  ;;  %2466 = vst [vmem:[%s4350_s12 + $0x30] sm:$0xff] %v2434_v26  ;;  %v2433_v11 = vmax.f32 %v2401_v21, 0.0  ;;  %v2377_v56 = vmul.f32 %v2260_v53, %v4615_v7  ;;  %v2379_v24 = vmul.f32 %v2349_v51, %v4616_v34  ;;  %v2408_v13 = vadd.f32 %v2376_v43, %v976_v20  ;;  %v4627_v20 = vld [vmem:[#allocation45_spill] sm:$0xff]  ;;  %v4630_v26 = vld [vmem:[#allocation26_spill] sm:$0xff] }
 0x416   : > { %v2435_v25 = vmax.f32 %v2403_v9, 0.0  ;;  %v2410_v29 = vadd.f32 %v2378_v42, %v978_v38  ;;  %v2264_v46 = vpop.f32.mrf.mxu0  ;;  %v2353_v4 = vpop.f32.mrf.mxu1  ;;  %v4628_v38 = vld [vmem:[#allocation46_spill] sm:$0xff]  ;;  %v993_v28 = vadd.f32 %v4376_v50, %v4629_v55  ;;  %v995_v21 = vadd.f32 %v4376_v50, %v4630_v26  ;;  %v4631_v43 = vld [vmem:[#allocation43_spill] sm:$0xff]  ;;  %v4632_v42 = vld [vmem:[#allocation44_spill] sm:$0xff] }
 0x417   : > { %2465 = vst [vmem:[%s4350_s12 + $0x28] sm:$0xff] %v2433_v11  ;;  %v2409_v5 = vadd.f32 %v2377_v56, %v977_v23  ;;  %v2411_v14 = vadd.f32 %v2379_v24, %v979_v27  ;;  %v2384_v35 = vmul.f32 %v2264_v46, %v4619_v48  ;;  %v2386_v15 = vmul.f32 %v2353_v4, %v4620_v32 }
 0x418   : > { %2467 = vst [vmem:[%s4350_s12 + $0x38] sm:$0xff] %v2435_v25  ;;  %v2440_v1 = vmax.f32 %v2408_v13, 0.0  ;;  %v2442_v61 = vmax.f32 %v2410_v29, 0.0  ;;  %v2266_v10 = vpop.f32.mrf.mxu0  ;;  %v2355_v6 = vpop.f32.mrf.mxu1 }
 0x419   : > { %v2441_v3 = vmax.f32 %v2409_v5, 0.0  ;;  %v2443_v17 = vmax.f32 %v2411_v14, 0.0  ;;  %v2416_v63 = vadd.f32 %v2384_v35, %v984_v57  ;;  %v2418_v12 = vadd.f32 %v2386_v15, %v986_v47 }
 0x41a   : > { %2472 = vst [vmem:[%s4350_s12 + $0x60] sm:$0xff] %v2440_v1  ;;  %2474 = vst [vmem:[%s4350_s12 + $0x70] sm:$0xff] %v2442_v61  ;;  %v2385_v44 = vmul.f32 %v2266_v10, %v4625_v40  ;;  %v2387_v59 = vmul.f32 %v2355_v6, %v4626_v37  ;;  %v2270_v36 = vpop.f32.mrf.mxu0  ;;  %v2359_v54 = vpop.f32.mrf.mxu1 }
 0x41b   : > { %2473 = vst [vmem:[%s4350_s12 + $0x68] sm:$0xff] %v2441_v3  ;;  %2475 = vst [vmem:[%s4350_s12 + $0x78] sm:$0xff] %v2443_v17  ;;  %v2448_v19 = vmax.f32 %v2416_v63, 0.0  ;;  %v2450_v58 = vmax.f32 %v2418_v12, 0.0  ;;  %v2392_v60 = vmul.f32 %v2270_v36, %v4627_v20  ;;  %v2394_v31 = vmul.f32 %v2359_v54, %v4628_v38 }
 0x41c   : > { %v2417_v9 = vadd.f32 %v2385_v44, %v985_v18  ;;  %v2419_v22 = vadd.f32 %v2387_v59, %v987_v8  ;;  %v2272_v23 = vpop.f32.mrf.mxu0  ;;  %v2361_v62 = vpop.f32.mrf.mxu1 }
 0x41d   : > { %2480 = vst [vmem:[%s4350_s12 + $0xa0] sm:$0xff] %v2448_v19  ;;  %2482 = vst [vmem:[%s4350_s12 + $0xb0] sm:$0xff] %v2450_v58  ;;  %v2424_v27 = vadd.f32 %v2392_v60, %v992_v49  ;;  %v2426_v41 = vadd.f32 %v2394_v31, %v994_v39  ;;  %v2393_v52 = vmul.f32 %v2272_v23, %v4631_v43 }
 0x41e   : > { %v2395_v53 = vmul.f32 %v2361_v62, %v4632_v42  ;;  %v2449_v50 = vmax.f32 %v2417_v9, 0.0  ;;  %v2451_v51 = vmax.f32 %v2419_v22, 0.0 }
 0x41f   : > { %v2456_v11 = vmax.f32 %v2424_v27, 0.0  ;;  %v2458_v25 = vmax.f32 %v2426_v41, 0.0  ;;  %v2425_v7 = vadd.f32 %v2393_v52, %v993_v28 }
 0x420   : > { %v2427_v56 = vadd.f32 %v2395_v53, %v995_v21  ;;  %2481 = vst [vmem:[%s4350_s12 + $0xa8] sm:$0xff] %v2449_v50  ;;  %2483 = vst [vmem:[%s4350_s12 + $0xb8] sm:$0xff] %v2451_v51 }
 0x421   : > { %2488 = vst [vmem:[%s4350_s12 + $0xe0] sm:$0xff] %v2456_v11  ;;  %2490 = vst [vmem:[%s4350_s12 + $0xf0] sm:$0xff] %v2458_v25  ;;  %v2457_v34 = vmax.f32 %v2425_v7, 0.0 }
 0x422   : > { %v2459_v24 = vmax.f32 %v2427_v56, 0.0 }
 0x423   : > { %2489 = vst [vmem:[%s4350_s12 + $0xe8] sm:$0xff] %v2457_v34 }
 0x424   : > { %2491 = vst [vmem:[%s4350_s12 + $0xf8] sm:$0xff] %v2459_v24 }
 0x425   : > { %2933 = shalt.err (!%p2930_p10)
}
 0x426   : > { %s2934_s17 = scalar_lea.hbm %s4465_s18, 4096  ;;  %s2938_s29 = scalar_lea.hbm %s4522_s6, 8192 }
 0x427   : > { %p2935_p1 = scmp.ne.s32.totalorder %s4465_s18, %s2934_s17  ;;  %p2939_p0 = scmp.lt.s32.totalorder %s4465_s18, %s4522_s6 }
 0x428   : > { %p2940_p2 = scmp.lt.s32.totalorder %s2938_s29, %s2934_s17 }
 0x429   : > { %p2936_p3 = pnand %p2935_p1, %p4633_p12 }
 0x42a   : > { %p2941_p6 = por %p2940_p2, %p2939_p0 }
 0x42b   : > { %p2937_p9 = pneg %p2936_p3 }
 0x42d   : > { %p2942_p11 = pnand %p2941_p6, %p2937_p9 }
 0x42f   : > { %2945 = shalt.err (!%p2942_p11)
}
 0x430   : > { %s2997_s25 = smov 1024   ;;  %s2998_s16 = smov 2048  }
 0x431   : > { %s2999_s20 = smov 64  }
 0x432   : > { %2809 = dma.vmem_to_hbm [thread:$0]  (%p4633_p12), %s4469_s8, 4096, %s4465_s18, %s2493_s19, %s2997_s25, %s2998_s16, %s2999_s20  }
 0x433 PF: > { %s2521_s14 = sand.u32 1, %s2972_s21   ;;  %p4634_p13 = scmp.ne.s32.totalorder %s4550_s10, 0 }
 0x434   : > { %p4635_p4 = scmp.ge.s32.totalorder %s2984_s24, 2  ;;  %s2522_s15 = scalar_lea.sflag [#allocation4], %s2521_s14 }
 0x436   : > { %p2816_p5 = pnand %p4635_p4, %p4634_p13 }
 0x438   : > { %p2817_p7 = pneg %p2816_p5 }
 0x43a   : > { %2967 = dma.done.wait (%p2817_p7), %s2522_s15, 4096  }
 0x43b   : > { %2969 = vsyncadd (%p2817_p7), %s2522_s15, 4294963200  ;;  %p19_p8 = scmp.ge.s32.totalorder %s3060_s27, 4   ;;  %s4636_s21 = smov %s2976_s22 }
 0x43c   : > { %s4637_s22 = smov %s2980_s23  ;;  %s4638_s23 = smov %s3072_s30 }
 0x43d   : > { %s4639_s24 = smov %s3060_s27  ;;  %21 = sbr.rel (!%p19_p8) target bundleno = 5 (0x5), region = 89 }
 0x442   :  { %2527 = vsyncpa [#allocation3], 1 }
 0x443   :  { %2529 = vsyncpa [#allocation3 + $0x1], 1 }
 0x444   :  { %2530 = vsyncpa [#allocation4], 1 }
 0x445   :  { %2532 = vsyncpa [#allocation4 + $0x1], 1 }

</bundles_post_ra>
